<compile_context>
chip_gen: v5e
topology: v5e:2x2
jax: 0.10.0
libtpu: 0.0.40
codegen_flags: <defaults>
</compile_context>

<pallas_src>
import functools

import jax
import jax.numpy as jnp
from jax.experimental import pallas as pl
from jax.experimental.pallas import tpu as pltpu

# Model hyper-parameters (small, consistent with a DETR-style encoder layer).
D_MODEL = 32
N_HEAD = 4
HEAD_DIM = D_MODEL // N_HEAD
D_FF = 64
N_LAYERS = 2
EPS = 1e-5  # nn.LayerNorm default

# vec32 row layout per layer: [bv, bo, b2, g1, be1, g2, be2]  (7 rows)
_V32_PER_LAYER = 7


def _layer_norm(x, gamma, beta):
    # x: (T, D) f32, gamma/beta: (1, D)
    mu = jnp.mean(x, axis=-1, keepdims=True)
    var = jnp.mean((x - mu) ** 2, axis=-1, keepdims=True)  # biased, like PyTorch
    return (x - mu) * jax.lax.rsqrt(var + EPS) * gamma + beta


def fused_encoder_kernel(x_ref, pos_ref, w_a_ref, w_b_ref, v64_ref, v32_ref, o_ref):
    """All encoder layers + final LayerNorm for one activation block."""
    NB, S, D = x_ref.shape
    T = NB * S
    x = x_ref[...].astype(jnp.float32).reshape(T, D)
    pos = pos_ref[...].astype(jnp.float32).reshape(T, D)
    scale = 1.0 / float(HEAD_DIM) ** 0.5

    for l in range(N_LAYERS):  # static, unrolled at trace time
        wl = w_a_ref[l]                               # (D, 2D + D + D + D_FF)
        w_qk = wl[:, 0:2 * D]                         # [wq | wk]
        w_v = wl[:, 2 * D:3 * D]
        w_o = wl[:, 3 * D:4 * D]
        w_1 = wl[:, 4 * D:4 * D + D_FF]
        w_2 = w_b_ref[l]                              # (D_FF, D)

        v64_l = v64_ref[l]                            # (2, 2D) = [bq|bk , b1]
        b_qk = v64_l[0:1, :]
        b_1 = v64_l[1:2, :]

        r = _V32_PER_LAYER * l
        b_v = v32_ref[r + 0:r + 1, :]
        b_o = v32_ref[r + 1:r + 2, :]
        b_2 = v32_ref[r + 2:r + 3, :]
        g_1 = v32_ref[r + 3:r + 4, :]
        be_1 = v32_ref[r + 4:r + 5, :]
        g_2 = v32_ref[r + 5:r + 6, :]
        be_2 = v32_ref[r + 6:r + 7, :]

        # Fused Q/K projection; V uses x (no positional encoding).
        qk_in = x + pos
        qk = jnp.dot(qk_in, w_qk, preferred_element_type=jnp.float32) + b_qk   # (T, 2D)
        v = jnp.dot(x, w_v, preferred_element_type=jnp.float32) + b_v          # (T, D)
        q = qk[:, :D]
        k = qk[:, D:]

        # Multi-head attention: accumulate each head directly into the output
        # projection (no concatenate).
        attn = jnp.zeros((T, D), jnp.float32)
        for h in range(N_HEAD):  # static loop
            sl = slice(h * HEAD_DIM, (h + 1) * HEAD_DIM)
            qh = q[:, sl].reshape(NB, S, HEAD_DIM)
            kh = k[:, sl].reshape(NB, S, HEAD_DIM)
            vh = v[:, sl].reshape(NB, S, HEAD_DIM)
            s = jnp.einsum("bqd,bkd->bqk", qh, kh,
                           preferred_element_type=jnp.float32) * scale          # (NB,S,S)
            s = s - jnp.max(s, axis=-1, keepdims=True)
            p = jnp.exp(s)
            p = p * pl.reciprocal(jnp.sum(p, axis=-1, keepdims=True), approx=True)
            oh = jnp.einsum("bqk,bkd->bqd", p, vh,
                            preferred_element_type=jnp.float32)                 # (NB,S,HD)
            attn = attn + jnp.dot(oh.reshape(T, HEAD_DIM), w_o[sl, :],
                                  preferred_element_type=jnp.float32)
        attn = attn + b_o

        # Residual + LayerNorm 1
        x = _layer_norm(x + attn, g_1, be_1)

        # Feed-forward
        h1 = jnp.dot(x, w_1, preferred_element_type=jnp.float32) + b_1
        h1 = jnp.maximum(h1, 0.0)
        h2 = jnp.dot(h1, w_2, preferred_element_type=jnp.float32) + b_2

        # Residual + LayerNorm 2
        x = _layer_norm(x + h2, g_2, be_2)

    # Final LayerNorm (self.norm)
    rf = _V32_PER_LAYER * N_LAYERS
    x = _layer_norm(x, v32_ref[rf:rf + 1, :], v32_ref[rf + 1:rf + 2, :])

    o_ref[...] = x.reshape(NB, S, D).astype(o_ref.dtype)


def _full_spec(arr):
    """BlockSpec covering a whole (un-batched) parameter array."""
    n = arr.ndim
    return pl.BlockSpec(arr.shape, lambda b, _n=n: (0,) * _n)


def _use_per_batch_grid(batch):
    """True only on chips with 2 TensorCores per device (v7x-class)."""
    if batch <= 1:
        return False
    try:
        kind = jax.devices()[0].device_kind
    except Exception:  # pragma: no cover
        return False
    return "7" in kind


@functools.partial(jax.jit, static_argnames=("per_batch",))
def transformer_encoder(x, pos, w_a, w_b, vec64, vec32, *, per_batch=False):
    B, S, D = x.shape
    if per_batch and B > 1:
        grid = (B,)
        act_spec = pl.BlockSpec((1, S, D), lambda b: (b, 0, 0))
    else:
        grid = (1,)
        act_spec = pl.BlockSpec((B, S, D), lambda b: (0, 0, 0))

    params = (w_a, w_b, vec64, vec32)
    param_specs = [_full_spec(pv) for pv in params]

    # Advisory cost estimate so XLA schedules around this cheap kernel.
    t = B * S
    per_layer_flops = (2 * t * D * (2 * D)            # fused q/k projection
                       + 2 * t * D * D                # v projection
                       + 2 * B * N_HEAD * S * S * HEAD_DIM   # q @ k^T
                       + 2 * B * N_HEAD * S * S * HEAD_DIM   # p @ v
                       + 2 * t * D * D                # output projection
                       + 2 * t * D * D_FF             # ffn1
                       + 2 * t * D_FF * D)            # ffn2
    flops = N_LAYERS * per_layer_flops
    transcendentals = N_LAYERS * B * N_HEAD * S * S
    bytes_accessed = 4 * (3 * x.size + sum(pv.size for pv in params))
    cost = pl.CostEstimate(flops=flops, transcendentals=transcendentals,
                           bytes_accessed=bytes_accessed)

    return pl.pallas_call(
        fused_encoder_kernel,
        out_shape=jax.ShapeDtypeStruct((B, S, D), x.dtype),
        grid_spec=pltpu.PrefetchScalarGridSpec(
            num_scalar_prefetch=0,
            grid=grid,
            in_specs=[act_spec, act_spec] + param_specs,
            out_specs=act_spec,
        ),
        compiler_params=pltpu.CompilerParams(
            dimension_semantics=("parallel",)),
        cost_estimate=cost,
    )(x, pos, w_a, w_b, vec64, vec32)


def init_layer_params(key):
    ks = jax.random.split(key, 6)
    scale_d = 1.0 / jnp.sqrt(jnp.float32(D_MODEL))
    scale_ff = 1.0 / jnp.sqrt(jnp.float32(D_FF))
    f32 = jnp.float32
    return {
        "wq": jax.random.normal(ks[0], (D_MODEL, D_MODEL), f32) * scale_d,
        "bq": jnp.zeros((D_MODEL,), f32),
        "wk": jax.random.normal(ks[1], (D_MODEL, D_MODEL), f32) * scale_d,
        "bk": jnp.zeros((D_MODEL,), f32),
        "wv": jax.random.normal(ks[2], (D_MODEL, D_MODEL), f32) * scale_d,
        "bv": jnp.zeros((D_MODEL,), f32),
        "wo": jax.random.normal(ks[3], (D_MODEL, D_MODEL), f32) * scale_d,
        "bo": jnp.zeros((D_MODEL,), f32),
        "w1": jax.random.normal(ks[4], (D_MODEL, D_FF), f32) * scale_d,
        "b1": jnp.zeros((D_FF,), f32),
        "w2": jax.random.normal(ks[5], (D_FF, D_MODEL), f32) * scale_ff,
        "b2": jnp.zeros((D_MODEL,), f32),
        "g1": jnp.ones((D_MODEL,), f32),
        "be1": jnp.zeros((D_MODEL,), f32),
        "g2": jnp.ones((D_MODEL,), f32),
        "be2": jnp.zeros((D_MODEL,), f32),
    }


def pack_params(layer_params, final_gamma, final_beta):
    """Pack 16*N_LAYERS + 2 small tensors into 4 slabs (4 param DMAs)."""
    w_a = jnp.stack([
        jnp.concatenate([p["wq"], p["wk"], p["wv"], p["wo"], p["w1"]], axis=1)
        for p in layer_params])                                   # (L, D, 5D + D_FF - D) = (L, 32, 192)
    w_b = jnp.stack([p["w2"] for p in layer_params])              # (L, D_FF, D)
    vec64 = jnp.stack([
        jnp.stack([jnp.concatenate([p["bq"], p["bk"]]), p["b1"]])
        for p in layer_params])                                   # (L, 2, 2D)
    rows = []
    for p in layer_params:
        rows += [p["bv"], p["bo"], p["b2"], p["g1"], p["be1"], p["g2"], p["be2"]]
    rows += [final_gamma, final_beta]
    vec32 = jnp.stack(rows)                                       # (7L + 2, D)
    return w_a, w_b, vec64, vec32


def _reference_forward(x, pos, layer_params, final_gamma, final_beta):
    """Pure-JAX reference of the same forward pass (for a sanity check)."""
    def ln(v, g, b):
        mu = jnp.mean(v, -1, keepdims=True)
        var = jnp.mean((v - mu) ** 2, -1, keepdims=True)
        return (v - mu) * jax.lax.rsqrt(var + EPS) * g + b

    B, S, D = x.shape
    for p in layer_params:
        qk_in = x + pos
        q = qk_in @ p["wq"] + p["bq"]
        k = qk_in @ p["wk"] + p["bk"]
        v = x @ p["wv"] + p["bv"]
        q = q.reshape(B, S, N_HEAD, HEAD_DIM).transpose(0, 2, 1, 3)
        k = k.reshape(B, S, N_HEAD, HEAD_DIM).transpose(0, 2, 1, 3)
        vv = v.reshape(B, S, N_HEAD, HEAD_DIM).transpose(0, 2, 1, 3)
        s = jnp.einsum("bhqd,bhkd->bhqk", q, k) / jnp.sqrt(jnp.float32(HEAD_DIM))
        pa = jax.nn.softmax(s, axis=-1)
        o = jnp.einsum("bhqk,bhkd->bhqd", pa, vv).transpose(0, 2, 1, 3).reshape(B, S, D)
        o = o @ p["wo"] + p["bo"]
        x = ln(x + o, p["g1"], p["be1"])
        h = jnp.maximum(x @ p["w1"] + p["b1"], 0.0)
        h = h @ p["w2"] + p["b2"]
        x = ln(x + h, p["g2"], p["be2"])
    return ln(x, final_gamma, final_beta)


if __name__ == "__main__":
    key = jax.random.PRNGKey(0)
    k_x, k_pos, k_params = jax.random.split(key, 3)

    B, S = 2, 8
    x = jax.random.normal(k_x, (B, S, D_MODEL), jnp.float32)
    pos = jax.random.normal(k_pos, (B, S, D_MODEL), jnp.float32)

    layer_keys = jax.random.split(k_params, N_LAYERS)
    layer_params = tuple(init_layer_params(k) for k in layer_keys)
    final_gamma = jnp.ones((D_MODEL,), jnp.float32)
    final_beta = jnp.zeros((D_MODEL,), jnp.float32)

    w_a, w_b, vec64, vec32 = pack_params(layer_params, final_gamma, final_beta)

    per_batch = _use_per_batch_grid(B)  # 2-TC chips (v7x): one batch elem per core
    out = transformer_encoder(x, pos, w_a, w_b, vec64, vec32, per_batch=per_batch)
    out = jax.block_until_ready(out)

    ref = _reference_forward(x, pos, layer_params, final_gamma, final_beta)

    assert out.shape == (B, S, D_MODEL)
    assert jnp.all(jnp.isfinite(out))
    # Generous tolerance: kernel uses approximate EUP reciprocal in the softmax.
    assert jnp.allclose(out, ref, rtol=1e-2, atol=1e-2), float(jnp.max(jnp.abs(out - ref)))
    print("KERNEL_OK")
</pallas_src>

<mosaic_0001>
module attributes {stable_mosaic.version = 11 : i64} {
  func.func @fused_encoder_kernel(%arg0: i32, %arg1: memref<2x8x32xf32, #tpu.memory_space<vmem>>, %arg2: memref<2x8x32xf32, #tpu.memory_space<vmem>>, %arg3: memref<2x32x192xf32, #tpu.memory_space<vmem>>, %arg4: memref<2x64x32xf32, #tpu.memory_space<vmem>>, %arg5: memref<2x2x64xf32, #tpu.memory_space<vmem>>, %arg6: memref<16x32xf32, #tpu.memory_space<vmem>>, %arg7: memref<2x8x32xf32, #tpu.memory_space<vmem>>) attributes {dimension_semantics = [#tpu.dimension_semantics<parallel>], iteration_bounds = array<i64: 1>, scalar_prefetch = 0 : i64, scratch_operands = 0 : i64, tpu.core_type = #tpu.core_type<tc>, window_params = [{pipeline_mode = #tpu.pipeline_mode<synchronous>, transform_indices = @transform_0, window_bounds = array<i64: 2, 8, 32>}, {pipeline_mode = #tpu.pipeline_mode<synchronous>, transform_indices = @transform_1, window_bounds = array<i64: 2, 8, 32>}, {pipeline_mode = #tpu.pipeline_mode<synchronous>, transform_indices = @transform_2, window_bounds = array<i64: 2, 32, 192>}, {pipeline_mode = #tpu.pipeline_mode<synchronous>, transform_indices = @transform_3, window_bounds = array<i64: 2, 64, 32>}, {pipeline_mode = #tpu.pipeline_mode<synchronous>, transform_indices = @transform_4, window_bounds = array<i64: 2, 2, 64>}, {pipeline_mode = #tpu.pipeline_mode<synchronous>, transform_indices = @transform_5, window_bounds = array<i64: 16, 32>}, {pipeline_mode = #tpu.pipeline_mode<synchronous>, transform_indices = @transform_6, window_bounds = array<i64: 2, 8, 32>}]} {
    %c0 = arith.constant 0 : index
    %c0_0 = arith.constant 0 : index
    %c0_1 = arith.constant 0 : index
    %0 = vector.load %arg1[%c0, %c0_0, %c0_1] : memref<2x8x32xf32, #tpu.memory_space<vmem>>, vector<2x8x32xf32>
    %1 = vector.shape_cast %0 : vector<2x8x32xf32> to vector<16x32xf32>
    %c0_2 = arith.constant 0 : index
    %c0_3 = arith.constant 0 : index
    %c0_4 = arith.constant 0 : index
    %2 = vector.load %arg2[%c0_2, %c0_3, %c0_4] : memref<2x8x32xf32, #tpu.memory_space<vmem>>, vector<2x8x32xf32>
    %3 = vector.shape_cast %2 : vector<2x8x32xf32> to vector<16x32xf32>
    %c0_5 = arith.constant 0 : index
    %c0_6 = arith.constant 0 : index
    %c0_7 = arith.constant 0 : index
    %4 = vector.load %arg3[%c0_5, %c0_6, %c0_7] : memref<2x32x192xf32, #tpu.memory_space<vmem>>, vector<1x32x192xf32>
    %5 = vector.shape_cast %4 : vector<1x32x192xf32> to vector<32x192xf32>
    %6 = vector.extract_strided_slice %5 {offsets = [0, 0], sizes = [32, 64], strides = [1, 1]} : vector<32x192xf32> to vector<32x64xf32>
    %7 = vector.extract_strided_slice %5 {offsets = [0, 64], sizes = [32, 32], strides = [1, 1]} : vector<32x192xf32> to vector<32x32xf32>
    %8 = vector.extract_strided_slice %5 {offsets = [0, 96], sizes = [32, 32], strides = [1, 1]} : vector<32x192xf32> to vector<32x32xf32>
    %9 = vector.extract_strided_slice %5 {offsets = [0, 128], sizes = [32, 64], strides = [1, 1]} : vector<32x192xf32> to vector<32x64xf32>
    %c0_8 = arith.constant 0 : index
    %c0_9 = arith.constant 0 : index
    %c0_10 = arith.constant 0 : index
    %10 = vector.load %arg4[%c0_8, %c0_9, %c0_10] : memref<2x64x32xf32, #tpu.memory_space<vmem>>, vector<1x64x32xf32>
    %11 = vector.shape_cast %10 : vector<1x64x32xf32> to vector<64x32xf32>
    %c0_11 = arith.constant 0 : index
    %c0_12 = arith.constant 0 : index
    %c0_13 = arith.constant 0 : index
    %12 = vector.load %arg5[%c0_11, %c0_12, %c0_13] : memref<2x2x64xf32, #tpu.memory_space<vmem>>, vector<1x2x64xf32>
    %13 = vector.shape_cast %12 : vector<1x2x64xf32> to vector<2x64xf32>
    %14 = vector.extract_strided_slice %13 {offsets = [0, 0], sizes = [1, 64], strides = [1, 1]} : vector<2x64xf32> to vector<1x64xf32>
    %15 = vector.extract_strided_slice %13 {offsets = [1, 0], sizes = [1, 64], strides = [1, 1]} : vector<2x64xf32> to vector<1x64xf32>
    %c0_14 = arith.constant 0 : index
    %c0_15 = arith.constant 0 : index
    %16 = vector.load %arg6[%c0_14, %c0_15] : memref<16x32xf32, #tpu.memory_space<vmem>>, vector<1x32xf32>
    %c1 = arith.constant 1 : index
    %c0_16 = arith.constant 0 : index
    %17 = vector.load %arg6[%c1, %c0_16] : memref<16x32xf32, #tpu.memory_space<vmem>>, vector<1x32xf32>
    %c2 = arith.constant 2 : index
    %c0_17 = arith.constant 0 : index
    %18 = vector.load %arg6[%c2, %c0_17] : memref<16x32xf32, #tpu.memory_space<vmem>>, vector<1x32xf32>
    %c3 = arith.constant 3 : index
    %c0_18 = arith.constant 0 : index
    %19 = vector.load %arg6[%c3, %c0_18] : memref<16x32xf32, #tpu.memory_space<vmem>>, vector<1x32xf32>
    %c4 = arith.constant 4 : index
    %c0_19 = arith.constant 0 : index
    %20 = vector.load %arg6[%c4, %c0_19] : memref<16x32xf32, #tpu.memory_space<vmem>>, vector<1x32xf32>
    %c5 = arith.constant 5 : index
    %c0_20 = arith.constant 0 : index
    %21 = vector.load %arg6[%c5, %c0_20] : memref<16x32xf32, #tpu.memory_space<vmem>>, vector<1x32xf32>
    %c6 = arith.constant 6 : index
    %c0_21 = arith.constant 0 : index
    %22 = vector.load %arg6[%c6, %c0_21] : memref<16x32xf32, #tpu.memory_space<vmem>>, vector<1x32xf32>
    %23 = arith.addf %1, %3 : vector<16x32xf32>
    %cst = arith.constant dense<0.000000e+00> : vector<16x64xf32>
    %24 = tpu.matmul %23, %6, %cst {dimension_numbers = #tpu.dot_dimension_numbers<[1], [0], [0], [1], [0, 0, 1, 1], [], []>} : vector<16x32xf32>, vector<32x64xf32>, vector<16x64xf32> -> vector<16x64xf32>
    %25 = vector.broadcast %14 : vector<1x64xf32> to vector<16x64xf32>
    %26 = arith.addf %24, %25 : vector<16x64xf32>
    %cst_22 = arith.constant dense<0.000000e+00> : vector<16x32xf32>
    %27 = tpu.matmul %1, %7, %cst_22 {dimension_numbers = #tpu.dot_dimension_numbers<[1], [0], [0], [1], [0, 0, 1, 1], [], []>} : vector<16x32xf32>, vector<32x32xf32>, vector<16x32xf32> -> vector<16x32xf32>
    %28 = vector.broadcast %16 : vector<1x32xf32> to vector<16x32xf32>
    %29 = arith.addf %27, %28 : vector<16x32xf32>
    %30 = vector.extract_strided_slice %26 {offsets = [0, 0], sizes = [16, 32], strides = [1, 1]} : vector<16x64xf32> to vector<16x32xf32>
    %31 = vector.extract_strided_slice %26 {offsets = [0, 32], sizes = [16, 32], strides = [1, 1]} : vector<16x64xf32> to vector<16x32xf32>
    %cst_23 = arith.constant 0.000000e+00 : f32
    %32 = vector.broadcast %cst_23 : f32 to vector<16x32xf32>
    %33 = vector.extract_strided_slice %30 {offsets = [0, 0], sizes = [16, 8], strides = [1, 1]} : vector<16x32xf32> to vector<16x8xf32>
    %34 = vector.shape_cast %33 : vector<16x8xf32> to vector<2x8x8xf32>
    %35 = vector.extract_strided_slice %31 {offsets = [0, 0], sizes = [16, 8], strides = [1, 1]} : vector<16x32xf32> to vector<16x8xf32>
    %36 = vector.shape_cast %35 : vector<16x8xf32> to vector<2x8x8xf32>
    %37 = vector.extract_strided_slice %29 {offsets = [0, 0], sizes = [16, 8], strides = [1, 1]} : vector<16x32xf32> to vector<16x8xf32>
    %38 = vector.shape_cast %37 : vector<16x8xf32> to vector<2x8x8xf32>
    "tpu.trace_start"() <{level = 10 : i32, message = "bqd,bkd->bqk"}> : () -> ()
    %cst_24 = arith.constant dense<0.000000e+00> : vector<2x8x8xf32>
    %39 = tpu.matmul %34, %36, %cst_24 {dimension_numbers = #tpu.dot_dimension_numbers<[2], [2], [1], [1], [0, 0, 0, 1, 1, 1], [0], [0]>} : vector<2x8x8xf32>, vector<2x8x8xf32>, vector<2x8x8xf32> -> vector<2x8x8xf32>
    "tpu.trace_stop"() : () -> ()
    %cst_25 = arith.constant 0.353553385 : f32
    %40 = vector.broadcast %cst_25 : f32 to vector<2x8x8xf32>
    %41 = arith.mulf %39, %40 : vector<2x8x8xf32>
    %cst_26 = arith.constant dense<0xFF800000> : vector<2x8xf32>
    %42 = vector.multi_reduction <maximumf>, %41, %cst_26 [2] : vector<2x8x8xf32> to vector<2x8xf32>
    %43 = vector.shape_cast %42 : vector<2x8xf32> to vector<2x8x1xf32>
    %44 = vector.broadcast %43 : vector<2x8x1xf32> to vector<2x8x8xf32>
    %45 = arith.subf %41, %44 : vector<2x8x8xf32>
    %46 = math.exp %45 : vector<2x8x8xf32>
    %cst_27 = arith.constant dense<0.000000e+00> : vector<2x8xf32>
    %47 = vector.multi_reduction <add>, %46, %cst_27 [2] : vector<2x8x8xf32> to vector<2x8xf32>
    %48 = vector.shape_cast %47 : vector<2x8xf32> to vector<2x8x1xf32>
    %49 = tpu.reciprocal %48 {approx = true} : vector<2x8x1xf32> -> vector<2x8x1xf32>
    %50 = vector.broadcast %49 : vector<2x8x1xf32> to vector<2x8x8xf32>
    %51 = arith.mulf %46, %50 : vector<2x8x8xf32>
    "tpu.trace_start"() <{level = 10 : i32, message = "bqk,bkd->bqd"}> : () -> ()
    %cst_28 = arith.constant dense<0.000000e+00> : vector<2x8x8xf32>
    %52 = tpu.matmul %51, %38, %cst_28 {dimension_numbers = #tpu.dot_dimension_numbers<[2], [1], [1], [2], [0, 0, 0, 1, 1, 2], [0], [0]>} : vector<2x8x8xf32>, vector<2x8x8xf32>, vector<2x8x8xf32> -> vector<2x8x8xf32>
    "tpu.trace_stop"() : () -> ()
    %53 = vector.shape_cast %52 : vector<2x8x8xf32> to vector<16x8xf32>
    %54 = vector.extract_strided_slice %8 {offsets = [0, 0], sizes = [8, 32], strides = [1, 1]} : vector<32x32xf32> to vector<8x32xf32>
    %cst_29 = arith.constant dense<0.000000e+00> : vector<16x32xf32>
    %55 = tpu.matmul %53, %54, %cst_29 {dimension_numbers = #tpu.dot_dimension_numbers<[1], [0], [0], [1], [0, 0, 1, 1], [], []>} : vector<16x8xf32>, vector<8x32xf32>, vector<16x32xf32> -> vector<16x32xf32>
    %56 = arith.addf %32, %55 : vector<16x32xf32>
    %57 = vector.extract_strided_slice %30 {offsets = [0, 8], sizes = [16, 8], strides = [1, 1]} : vector<16x32xf32> to vector<16x8xf32>
    %58 = vector.shape_cast %57 : vector<16x8xf32> to vector<2x8x8xf32>
    %59 = vector.extract_strided_slice %31 {offsets = [0, 8], sizes = [16, 8], strides = [1, 1]} : vector<16x32xf32> to vector<16x8xf32>
    %60 = vector.shape_cast %59 : vector<16x8xf32> to vector<2x8x8xf32>
    %61 = vector.extract_strided_slice %29 {offsets = [0, 8], sizes = [16, 8], strides = [1, 1]} : vector<16x32xf32> to vector<16x8xf32>
    %62 = vector.shape_cast %61 : vector<16x8xf32> to vector<2x8x8xf32>
    "tpu.trace_start"() <{level = 10 : i32, message = "bqd,bkd->bqk"}> : () -> ()
    %cst_30 = arith.constant dense<0.000000e+00> : vector<2x8x8xf32>
    %63 = tpu.matmul %58, %60, %cst_30 {dimension_numbers = #tpu.dot_dimension_numbers<[2], [2], [1], [1], [0, 0, 0, 1, 1, 1], [0], [0]>} : vector<2x8x8xf32>, vector<2x8x8xf32>, vector<2x8x8xf32> -> vector<2x8x8xf32>
    "tpu.trace_stop"() : () -> ()
    %cst_31 = arith.constant 0.353553385 : f32
    %64 = vector.broadcast %cst_31 : f32 to vector<2x8x8xf32>
    %65 = arith.mulf %63, %64 : vector<2x8x8xf32>
    %cst_32 = arith.constant dense<0xFF800000> : vector<2x8xf32>
    %66 = vector.multi_reduction <maximumf>, %65, %cst_32 [2] : vector<2x8x8xf32> to vector<2x8xf32>
    %67 = vector.shape_cast %66 : vector<2x8xf32> to vector<2x8x1xf32>
    %68 = vector.broadcast %67 : vector<2x8x1xf32> to vector<2x8x8xf32>
    %69 = arith.subf %65, %68 : vector<2x8x8xf32>
    %70 = math.exp %69 : vector<2x8x8xf32>
    %cst_33 = arith.constant dense<0.000000e+00> : vector<2x8xf32>
    %71 = vector.multi_reduction <add>, %70, %cst_33 [2] : vector<2x8x8xf32> to vector<2x8xf32>
    %72 = vector.shape_cast %71 : vector<2x8xf32> to vector<2x8x1xf32>
    %73 = tpu.reciprocal %72 {approx = true} : vector<2x8x1xf32> -> vector<2x8x1xf32>
    %74 = vector.broadcast %73 : vector<2x8x1xf32> to vector<2x8x8xf32>
    %75 = arith.mulf %70, %74 : vector<2x8x8xf32>
    "tpu.trace_start"() <{level = 10 : i32, message = "bqk,bkd->bqd"}> : () -> ()
    %cst_34 = arith.constant dense<0.000000e+00> : vector<2x8x8xf32>
    %76 = tpu.matmul %75, %62, %cst_34 {dimension_numbers = #tpu.dot_dimension_numbers<[2], [1], [1], [2], [0, 0, 0, 1, 1, 2], [0], [0]>} : vector<2x8x8xf32>, vector<2x8x8xf32>, vector<2x8x8xf32> -> vector<2x8x8xf32>
    "tpu.trace_stop"() : () -> ()
    %77 = vector.shape_cast %76 : vector<2x8x8xf32> to vector<16x8xf32>
    %78 = vector.extract_strided_slice %8 {offsets = [8, 0], sizes = [8, 32], strides = [1, 1]} : vector<32x32xf32> to vector<8x32xf32>
    %cst_35 = arith.constant dense<0.000000e+00> : vector<16x32xf32>
    %79 = tpu.matmul %77, %78, %cst_35 {dimension_numbers = #tpu.dot_dimension_numbers<[1], [0], [0], [1], [0, 0, 1, 1], [], []>} : vector<16x8xf32>, vector<8x32xf32>, vector<16x32xf32> -> vector<16x32xf32>
    %80 = arith.addf %56, %79 : vector<16x32xf32>
    %81 = vector.extract_strided_slice %30 {offsets = [0, 16], sizes = [16, 8], strides = [1, 1]} : vector<16x32xf32> to vector<16x8xf32>
    %82 = vector.shape_cast %81 : vector<16x8xf32> to vector<2x8x8xf32>
    %83 = vector.extract_strided_slice %31 {offsets = [0, 16], sizes = [16, 8], strides = [1, 1]} : vector<16x32xf32> to vector<16x8xf32>
    %84 = vector.shape_cast %83 : vector<16x8xf32> to vector<2x8x8xf32>
    %85 = vector.extract_strided_slice %29 {offsets = [0, 16], sizes = [16, 8], strides = [1, 1]} : vector<16x32xf32> to vector<16x8xf32>
    %86 = vector.shape_cast %85 : vector<16x8xf32> to vector<2x8x8xf32>
    "tpu.trace_start"() <{level = 10 : i32, message = "bqd,bkd->bqk"}> : () -> ()
    %cst_36 = arith.constant dense<0.000000e+00> : vector<2x8x8xf32>
    %87 = tpu.matmul %82, %84, %cst_36 {dimension_numbers = #tpu.dot_dimension_numbers<[2], [2], [1], [1], [0, 0, 0, 1, 1, 1], [0], [0]>} : vector<2x8x8xf32>, vector<2x8x8xf32>, vector<2x8x8xf32> -> vector<2x8x8xf32>
    "tpu.trace_stop"() : () -> ()
    %cst_37 = arith.constant 0.353553385 : f32
    %88 = vector.broadcast %cst_37 : f32 to vector<2x8x8xf32>
    %89 = arith.mulf %87, %88 : vector<2x8x8xf32>
    %cst_38 = arith.constant dense<0xFF800000> : vector<2x8xf32>
    %90 = vector.multi_reduction <maximumf>, %89, %cst_38 [2] : vector<2x8x8xf32> to vector<2x8xf32>
    %91 = vector.shape_cast %90 : vector<2x8xf32> to vector<2x8x1xf32>
    %92 = vector.broadcast %91 : vector<2x8x1xf32> to vector<2x8x8xf32>
    %93 = arith.subf %89, %92 : vector<2x8x8xf32>
    %94 = math.exp %93 : vector<2x8x8xf32>
    %cst_39 = arith.constant dense<0.000000e+00> : vector<2x8xf32>
    %95 = vector.multi_reduction <add>, %94, %cst_39 [2] : vector<2x8x8xf32> to vector<2x8xf32>
    %96 = vector.shape_cast %95 : vector<2x8xf32> to vector<2x8x1xf32>
    %97 = tpu.reciprocal %96 {approx = true} : vector<2x8x1xf32> -> vector<2x8x1xf32>
    %98 = vector.broadcast %97 : vector<2x8x1xf32> to vector<2x8x8xf32>
    %99 = arith.mulf %94, %98 : vector<2x8x8xf32>
    "tpu.trace_start"() <{level = 10 : i32, message = "bqk,bkd->bqd"}> : () -> ()
    %cst_40 = arith.constant dense<0.000000e+00> : vector<2x8x8xf32>
    %100 = tpu.matmul %99, %86, %cst_40 {dimension_numbers = #tpu.dot_dimension_numbers<[2], [1], [1], [2], [0, 0, 0, 1, 1, 2], [0], [0]>} : vector<2x8x8xf32>, vector<2x8x8xf32>, vector<2x8x8xf32> -> vector<2x8x8xf32>
    "tpu.trace_stop"() : () -> ()
    %101 = vector.shape_cast %100 : vector<2x8x8xf32> to vector<16x8xf32>
    %102 = vector.extract_strided_slice %8 {offsets = [16, 0], sizes = [8, 32], strides = [1, 1]} : vector<32x32xf32> to vector<8x32xf32>
    %cst_41 = arith.constant dense<0.000000e+00> : vector<16x32xf32>
    %103 = tpu.matmul %101, %102, %cst_41 {dimension_numbers = #tpu.dot_dimension_numbers<[1], [0], [0], [1], [0, 0, 1, 1], [], []>} : vector<16x8xf32>, vector<8x32xf32>, vector<16x32xf32> -> vector<16x32xf32>
    %104 = arith.addf %80, %103 : vector<16x32xf32>
    %105 = vector.extract_strided_slice %30 {offsets = [0, 24], sizes = [16, 8], strides = [1, 1]} : vector<16x32xf32> to vector<16x8xf32>
    %106 = vector.shape_cast %105 : vector<16x8xf32> to vector<2x8x8xf32>
    %107 = vector.extract_strided_slice %31 {offsets = [0, 24], sizes = [16, 8], strides = [1, 1]} : vector<16x32xf32> to vector<16x8xf32>
    %108 = vector.shape_cast %107 : vector<16x8xf32> to vector<2x8x8xf32>
    %109 = vector.extract_strided_slice %29 {offsets = [0, 24], sizes = [16, 8], strides = [1, 1]} : vector<16x32xf32> to vector<16x8xf32>
    %110 = vector.shape_cast %109 : vector<16x8xf32> to vector<2x8x8xf32>
    "tpu.trace_start"() <{level = 10 : i32, message = "bqd,bkd->bqk"}> : () -> ()
    %cst_42 = arith.constant dense<0.000000e+00> : vector<2x8x8xf32>
    %111 = tpu.matmul %106, %108, %cst_42 {dimension_numbers = #tpu.dot_dimension_numbers<[2], [2], [1], [1], [0, 0, 0, 1, 1, 1], [0], [0]>} : vector<2x8x8xf32>, vector<2x8x8xf32>, vector<2x8x8xf32> -> vector<2x8x8xf32>
    "tpu.trace_stop"() : () -> ()
    %cst_43 = arith.constant 0.353553385 : f32
    %112 = vector.broadcast %cst_43 : f32 to vector<2x8x8xf32>
    %113 = arith.mulf %111, %112 : vector<2x8x8xf32>
    %cst_44 = arith.constant dense<0xFF800000> : vector<2x8xf32>
    %114 = vector.multi_reduction <maximumf>, %113, %cst_44 [2] : vector<2x8x8xf32> to vector<2x8xf32>
    %115 = vector.shape_cast %114 : vector<2x8xf32> to vector<2x8x1xf32>
    %116 = vector.broadcast %115 : vector<2x8x1xf32> to vector<2x8x8xf32>
    %117 = arith.subf %113, %116 : vector<2x8x8xf32>
    %118 = math.exp %117 : vector<2x8x8xf32>
    %cst_45 = arith.constant dense<0.000000e+00> : vector<2x8xf32>
    %119 = vector.multi_reduction <add>, %118, %cst_45 [2] : vector<2x8x8xf32> to vector<2x8xf32>
    %120 = vector.shape_cast %119 : vector<2x8xf32> to vector<2x8x1xf32>
    %121 = tpu.reciprocal %120 {approx = true} : vector<2x8x1xf32> -> vector<2x8x1xf32>
    %122 = vector.broadcast %121 : vector<2x8x1xf32> to vector<2x8x8xf32>
    %123 = arith.mulf %118, %122 : vector<2x8x8xf32>
    "tpu.trace_start"() <{level = 10 : i32, message = "bqk,bkd->bqd"}> : () -> ()
    %cst_46 = arith.constant dense<0.000000e+00> : vector<2x8x8xf32>
    %124 = tpu.matmul %123, %110, %cst_46 {dimension_numbers = #tpu.dot_dimension_numbers<[2], [1], [1], [2], [0, 0, 0, 1, 1, 2], [0], [0]>} : vector<2x8x8xf32>, vector<2x8x8xf32>, vector<2x8x8xf32> -> vector<2x8x8xf32>
    "tpu.trace_stop"() : () -> ()
    %125 = vector.shape_cast %124 : vector<2x8x8xf32> to vector<16x8xf32>
    %126 = vector.extract_strided_slice %8 {offsets = [24, 0], sizes = [8, 32], strides = [1, 1]} : vector<32x32xf32> to vector<8x32xf32>
    %cst_47 = arith.constant dense<0.000000e+00> : vector<16x32xf32>
    %127 = tpu.matmul %125, %126, %cst_47 {dimension_numbers = #tpu.dot_dimension_numbers<[1], [0], [0], [1], [0, 0, 1, 1], [], []>} : vector<16x8xf32>, vector<8x32xf32>, vector<16x32xf32> -> vector<16x32xf32>
    %128 = arith.addf %104, %127 : vector<16x32xf32>
    %129 = vector.broadcast %17 : vector<1x32xf32> to vector<16x32xf32>
    %130 = arith.addf %128, %129 : vector<16x32xf32>
    %131 = arith.addf %1, %130 : vector<16x32xf32>
    %cst_48 = arith.constant dense<0.000000e+00> : vector<16xf32>
    %132 = vector.multi_reduction <add>, %131, %cst_48 [1] : vector<16x32xf32> to vector<16xf32>
    %133 = vector.shape_cast %132 : vector<16xf32> to vector<16x1xf32>
    %cst_49 = arith.constant 3.200000e+01 : f32
    %134 = vector.broadcast %cst_49 : f32 to vector<16x1xf32>
    %135 = arith.divf %133, %134 : vector<16x1xf32>
    %136 = vector.broadcast %135 : vector<16x1xf32> to vector<16x32xf32>
    %137 = arith.subf %131, %136 : vector<16x32xf32>
    %138 = arith.mulf %137, %137 : vector<16x32xf32>
    %cst_50 = arith.constant dense<0.000000e+00> : vector<16xf32>
    %139 = vector.multi_reduction <add>, %138, %cst_50 [1] : vector<16x32xf32> to vector<16xf32>
    %140 = vector.shape_cast %139 : vector<16xf32> to vector<16x1xf32>
    %cst_51 = arith.constant 3.200000e+01 : f32
    %141 = vector.broadcast %cst_51 : f32 to vector<16x1xf32>
    %142 = arith.divf %140, %141 : vector<16x1xf32>
    %143 = vector.broadcast %135 : vector<16x1xf32> to vector<16x32xf32>
    %144 = arith.subf %131, %143 : vector<16x32xf32>
    %cst_52 = arith.constant 9.99999974E-6 : f32
    %145 = vector.broadcast %cst_52 : f32 to vector<16x1xf32>
    %146 = arith.addf %142, %145 : vector<16x1xf32>
    %147 = math.rsqrt %146 : vector<16x1xf32>
    %148 = vector.broadcast %147 : vector<16x1xf32> to vector<16x32xf32>
    %149 = arith.mulf %144, %148 : vector<16x32xf32>
    %150 = vector.broadcast %19 : vector<1x32xf32> to vector<16x32xf32>
    %151 = arith.mulf %149, %150 : vector<16x32xf32>
    %152 = vector.broadcast %20 : vector<1x32xf32> to vector<16x32xf32>
    %153 = arith.addf %151, %152 : vector<16x32xf32>
    %cst_53 = arith.constant dense<0.000000e+00> : vector<16x64xf32>
    %154 = tpu.matmul %153, %9, %cst_53 {dimension_numbers = #tpu.dot_dimension_numbers<[1], [0], [0], [1], [0, 0, 1, 1], [], []>} : vector<16x32xf32>, vector<32x64xf32>, vector<16x64xf32> -> vector<16x64xf32>
    %155 = vector.broadcast %15 : vector<1x64xf32> to vector<16x64xf32>
    %156 = arith.addf %154, %155 : vector<16x64xf32>
    %cst_54 = arith.constant 0.000000e+00 : f32
    %157 = vector.broadcast %cst_54 : f32 to vector<16x64xf32>
    %158 = arith.maximumf %156, %157 : vector<16x64xf32>
    %cst_55 = arith.constant dense<0.000000e+00> : vector<16x32xf32>
    %159 = tpu.matmul %158, %11, %cst_55 {dimension_numbers = #tpu.dot_dimension_numbers<[1], [0], [0], [1], [0, 0, 1, 1], [], []>} : vector<16x64xf32>, vector<64x32xf32>, vector<16x32xf32> -> vector<16x32xf32>
    %160 = vector.broadcast %18 : vector<1x32xf32> to vector<16x32xf32>
    %161 = arith.addf %159, %160 : vector<16x32xf32>
    %162 = arith.addf %153, %161 : vector<16x32xf32>
    %cst_56 = arith.constant dense<0.000000e+00> : vector<16xf32>
    %163 = vector.multi_reduction <add>, %162, %cst_56 [1] : vector<16x32xf32> to vector<16xf32>
    %164 = vector.shape_cast %163 : vector<16xf32> to vector<16x1xf32>
    %cst_57 = arith.constant 3.200000e+01 : f32
    %165 = vector.broadcast %cst_57 : f32 to vector<16x1xf32>
    %166 = arith.divf %164, %165 : vector<16x1xf32>
    %167 = vector.broadcast %166 : vector<16x1xf32> to vector<16x32xf32>
    %168 = arith.subf %162, %167 : vector<16x32xf32>
    %169 = arith.mulf %168, %168 : vector<16x32xf32>
    %cst_58 = arith.constant dense<0.000000e+00> : vector<16xf32>
    %170 = vector.multi_reduction <add>, %169, %cst_58 [1] : vector<16x32xf32> to vector<16xf32>
    %171 = vector.shape_cast %170 : vector<16xf32> to vector<16x1xf32>
    %cst_59 = arith.constant 3.200000e+01 : f32
    %172 = vector.broadcast %cst_59 : f32 to vector<16x1xf32>
    %173 = arith.divf %171, %172 : vector<16x1xf32>
    %174 = vector.broadcast %166 : vector<16x1xf32> to vector<16x32xf32>
    %175 = arith.subf %162, %174 : vector<16x32xf32>
    %cst_60 = arith.constant 9.99999974E-6 : f32
    %176 = vector.broadcast %cst_60 : f32 to vector<16x1xf32>
    %177 = arith.addf %173, %176 : vector<16x1xf32>
    %178 = math.rsqrt %177 : vector<16x1xf32>
    %179 = vector.broadcast %178 : vector<16x1xf32> to vector<16x32xf32>
    %180 = arith.mulf %175, %179 : vector<16x32xf32>
    %181 = vector.broadcast %21 : vector<1x32xf32> to vector<16x32xf32>
    %182 = arith.mulf %180, %181 : vector<16x32xf32>
    %183 = vector.broadcast %22 : vector<1x32xf32> to vector<16x32xf32>
    %184 = arith.addf %182, %183 : vector<16x32xf32>
    %c1_61 = arith.constant 1 : index
    %c0_62 = arith.constant 0 : index
    %c0_63 = arith.constant 0 : index
    %185 = vector.load %arg3[%c1_61, %c0_62, %c0_63] : memref<2x32x192xf32, #tpu.memory_space<vmem>>, vector<1x32x192xf32>
    %186 = vector.shape_cast %185 : vector<1x32x192xf32> to vector<32x192xf32>
    %187 = vector.extract_strided_slice %186 {offsets = [0, 0], sizes = [32, 64], strides = [1, 1]} : vector<32x192xf32> to vector<32x64xf32>
    %188 = vector.extract_strided_slice %186 {offsets = [0, 64], sizes = [32, 32], strides = [1, 1]} : vector<32x192xf32> to vector<32x32xf32>
    %189 = vector.extract_strided_slice %186 {offsets = [0, 96], sizes = [32, 32], strides = [1, 1]} : vector<32x192xf32> to vector<32x32xf32>
    %190 = vector.extract_strided_slice %186 {offsets = [0, 128], sizes = [32, 64], strides = [1, 1]} : vector<32x192xf32> to vector<32x64xf32>
    %c1_64 = arith.constant 1 : index
    %c0_65 = arith.constant 0 : index
    %c0_66 = arith.constant 0 : index
    %191 = vector.load %arg4[%c1_64, %c0_65, %c0_66] : memref<2x64x32xf32, #tpu.memory_space<vmem>>, vector<1x64x32xf32>
    %192 = vector.shape_cast %191 : vector<1x64x32xf32> to vector<64x32xf32>
    %c1_67 = arith.constant 1 : index
    %c0_68 = arith.constant 0 : index
    %c0_69 = arith.constant 0 : index
    %193 = vector.load %arg5[%c1_67, %c0_68, %c0_69] : memref<2x2x64xf32, #tpu.memory_space<vmem>>, vector<1x2x64xf32>
    %194 = vector.shape_cast %193 : vector<1x2x64xf32> to vector<2x64xf32>
    %195 = vector.extract_strided_slice %194 {offsets = [0, 0], sizes = [1, 64], strides = [1, 1]} : vector<2x64xf32> to vector<1x64xf32>
    %196 = vector.extract_strided_slice %194 {offsets = [1, 0], sizes = [1, 64], strides = [1, 1]} : vector<2x64xf32> to vector<1x64xf32>
    %c7 = arith.constant 7 : index
    %c0_70 = arith.constant 0 : index
    %197 = vector.load %arg6[%c7, %c0_70] : memref<16x32xf32, #tpu.memory_space<vmem>>, vector<1x32xf32>
    %c8 = arith.constant 8 : index
    %c0_71 = arith.constant 0 : index
    %198 = vector.load %arg6[%c8, %c0_71] : memref<16x32xf32, #tpu.memory_space<vmem>>, vector<1x32xf32>
    %c9 = arith.constant 9 : index
    %c0_72 = arith.constant 0 : index
    %199 = vector.load %arg6[%c9, %c0_72] : memref<16x32xf32, #tpu.memory_space<vmem>>, vector<1x32xf32>
    %c10 = arith.constant 10 : index
    %c0_73 = arith.constant 0 : index
    %200 = vector.load %arg6[%c10, %c0_73] : memref<16x32xf32, #tpu.memory_space<vmem>>, vector<1x32xf32>
    %c11 = arith.constant 11 : index
    %c0_74 = arith.constant 0 : index
    %201 = vector.load %arg6[%c11, %c0_74] : memref<16x32xf32, #tpu.memory_space<vmem>>, vector<1x32xf32>
    %c12 = arith.constant 12 : index
    %c0_75 = arith.constant 0 : index
    %202 = vector.load %arg6[%c12, %c0_75] : memref<16x32xf32, #tpu.memory_space<vmem>>, vector<1x32xf32>
    %c13 = arith.constant 13 : index
    %c0_76 = arith.constant 0 : index
    %203 = vector.load %arg6[%c13, %c0_76] : memref<16x32xf32, #tpu.memory_space<vmem>>, vector<1x32xf32>
    %204 = arith.addf %184, %3 : vector<16x32xf32>
    %cst_77 = arith.constant dense<0.000000e+00> : vector<16x64xf32>
    %205 = tpu.matmul %204, %187, %cst_77 {dimension_numbers = #tpu.dot_dimension_numbers<[1], [0], [0], [1], [0, 0, 1, 1], [], []>} : vector<16x32xf32>, vector<32x64xf32>, vector<16x64xf32> -> vector<16x64xf32>
    %206 = vector.broadcast %195 : vector<1x64xf32> to vector<16x64xf32>
    %207 = arith.addf %205, %206 : vector<16x64xf32>
    %cst_78 = arith.constant dense<0.000000e+00> : vector<16x32xf32>
    %208 = tpu.matmul %184, %188, %cst_78 {dimension_numbers = #tpu.dot_dimension_numbers<[1], [0], [0], [1], [0, 0, 1, 1], [], []>} : vector<16x32xf32>, vector<32x32xf32>, vector<16x32xf32> -> vector<16x32xf32>
    %209 = vector.broadcast %197 : vector<1x32xf32> to vector<16x32xf32>
    %210 = arith.addf %208, %209 : vector<16x32xf32>
    %211 = vector.extract_strided_slice %207 {offsets = [0, 0], sizes = [16, 32], strides = [1, 1]} : vector<16x64xf32> to vector<16x32xf32>
    %212 = vector.extract_strided_slice %207 {offsets = [0, 32], sizes = [16, 32], strides = [1, 1]} : vector<16x64xf32> to vector<16x32xf32>
    %cst_79 = arith.constant 0.000000e+00 : f32
    %213 = vector.broadcast %cst_79 : f32 to vector<16x32xf32>
    %214 = vector.extract_strided_slice %211 {offsets = [0, 0], sizes = [16, 8], strides = [1, 1]} : vector<16x32xf32> to vector<16x8xf32>
    %215 = vector.shape_cast %214 : vector<16x8xf32> to vector<2x8x8xf32>
    %216 = vector.extract_strided_slice %212 {offsets = [0, 0], sizes = [16, 8], strides = [1, 1]} : vector<16x32xf32> to vector<16x8xf32>
    %217 = vector.shape_cast %216 : vector<16x8xf32> to vector<2x8x8xf32>
    %218 = vector.extract_strided_slice %210 {offsets = [0, 0], sizes = [16, 8], strides = [1, 1]} : vector<16x32xf32> to vector<16x8xf32>
    %219 = vector.shape_cast %218 : vector<16x8xf32> to vector<2x8x8xf32>
    "tpu.trace_start"() <{level = 10 : i32, message = "bqd,bkd->bqk"}> : () -> ()
    %cst_80 = arith.constant dense<0.000000e+00> : vector<2x8x8xf32>
    %220 = tpu.matmul %215, %217, %cst_80 {dimension_numbers = #tpu.dot_dimension_numbers<[2], [2], [1], [1], [0, 0, 0, 1, 1, 1], [0], [0]>} : vector<2x8x8xf32>, vector<2x8x8xf32>, vector<2x8x8xf32> -> vector<2x8x8xf32>
    "tpu.trace_stop"() : () -> ()
    %cst_81 = arith.constant 0.353553385 : f32
    %221 = vector.broadcast %cst_81 : f32 to vector<2x8x8xf32>
    %222 = arith.mulf %220, %221 : vector<2x8x8xf32>
    %cst_82 = arith.constant dense<0xFF800000> : vector<2x8xf32>
    %223 = vector.multi_reduction <maximumf>, %222, %cst_82 [2] : vector<2x8x8xf32> to vector<2x8xf32>
    %224 = vector.shape_cast %223 : vector<2x8xf32> to vector<2x8x1xf32>
    %225 = vector.broadcast %224 : vector<2x8x1xf32> to vector<2x8x8xf32>
    %226 = arith.subf %222, %225 : vector<2x8x8xf32>
    %227 = math.exp %226 : vector<2x8x8xf32>
    %cst_83 = arith.constant dense<0.000000e+00> : vector<2x8xf32>
    %228 = vector.multi_reduction <add>, %227, %cst_83 [2] : vector<2x8x8xf32> to vector<2x8xf32>
    %229 = vector.shape_cast %228 : vector<2x8xf32> to vector<2x8x1xf32>
    %230 = tpu.reciprocal %229 {approx = true} : vector<2x8x1xf32> -> vector<2x8x1xf32>
    %231 = vector.broadcast %230 : vector<2x8x1xf32> to vector<2x8x8xf32>
    %232 = arith.mulf %227, %231 : vector<2x8x8xf32>
    "tpu.trace_start"() <{level = 10 : i32, message = "bqk,bkd->bqd"}> : () -> ()
    %cst_84 = arith.constant dense<0.000000e+00> : vector<2x8x8xf32>
    %233 = tpu.matmul %232, %219, %cst_84 {dimension_numbers = #tpu.dot_dimension_numbers<[2], [1], [1], [2], [0, 0, 0, 1, 1, 2], [0], [0]>} : vector<2x8x8xf32>, vector<2x8x8xf32>, vector<2x8x8xf32> -> vector<2x8x8xf32>
    "tpu.trace_stop"() : () -> ()
    %234 = vector.shape_cast %233 : vector<2x8x8xf32> to vector<16x8xf32>
    %235 = vector.extract_strided_slice %189 {offsets = [0, 0], sizes = [8, 32], strides = [1, 1]} : vector<32x32xf32> to vector<8x32xf32>
    %cst_85 = arith.constant dense<0.000000e+00> : vector<16x32xf32>
    %236 = tpu.matmul %234, %235, %cst_85 {dimension_numbers = #tpu.dot_dimension_numbers<[1], [0], [0], [1], [0, 0, 1, 1], [], []>} : vector<16x8xf32>, vector<8x32xf32>, vector<16x32xf32> -> vector<16x32xf32>
    %237 = arith.addf %213, %236 : vector<16x32xf32>
    %238 = vector.extract_strided_slice %211 {offsets = [0, 8], sizes = [16, 8], strides = [1, 1]} : vector<16x32xf32> to vector<16x8xf32>
    %239 = vector.shape_cast %238 : vector<16x8xf32> to vector<2x8x8xf32>
    %240 = vector.extract_strided_slice %212 {offsets = [0, 8], sizes = [16, 8], strides = [1, 1]} : vector<16x32xf32> to vector<16x8xf32>
    %241 = vector.shape_cast %240 : vector<16x8xf32> to vector<2x8x8xf32>
    %242 = vector.extract_strided_slice %210 {offsets = [0, 8], sizes = [16, 8], strides = [1, 1]} : vector<16x32xf32> to vector<16x8xf32>
    %243 = vector.shape_cast %242 : vector<16x8xf32> to vector<2x8x8xf32>
    "tpu.trace_start"() <{level = 10 : i32, message = "bqd,bkd->bqk"}> : () -> ()
    %cst_86 = arith.constant dense<0.000000e+00> : vector<2x8x8xf32>
    %244 = tpu.matmul %239, %241, %cst_86 {dimension_numbers = #tpu.dot_dimension_numbers<[2], [2], [1], [1], [0, 0, 0, 1, 1, 1], [0], [0]>} : vector<2x8x8xf32>, vector<2x8x8xf32>, vector<2x8x8xf32> -> vector<2x8x8xf32>
    "tpu.trace_stop"() : () -> ()
    %cst_87 = arith.constant 0.353553385 : f32
    %245 = vector.broadcast %cst_87 : f32 to vector<2x8x8xf32>
    %246 = arith.mulf %244, %245 : vector<2x8x8xf32>
    %cst_88 = arith.constant dense<0xFF800000> : vector<2x8xf32>
    %247 = vector.multi_reduction <maximumf>, %246, %cst_88 [2] : vector<2x8x8xf32> to vector<2x8xf32>
    %248 = vector.shape_cast %247 : vector<2x8xf32> to vector<2x8x1xf32>
    %249 = vector.broadcast %248 : vector<2x8x1xf32> to vector<2x8x8xf32>
    %250 = arith.subf %246, %249 : vector<2x8x8xf32>
    %251 = math.exp %250 : vector<2x8x8xf32>
    %cst_89 = arith.constant dense<0.000000e+00> : vector<2x8xf32>
    %252 = vector.multi_reduction <add>, %251, %cst_89 [2] : vector<2x8x8xf32> to vector<2x8xf32>
    %253 = vector.shape_cast %252 : vector<2x8xf32> to vector<2x8x1xf32>
    %254 = tpu.reciprocal %253 {approx = true} : vector<2x8x1xf32> -> vector<2x8x1xf32>
    %255 = vector.broadcast %254 : vector<2x8x1xf32> to vector<2x8x8xf32>
    %256 = arith.mulf %251, %255 : vector<2x8x8xf32>
    "tpu.trace_start"() <{level = 10 : i32, message = "bqk,bkd->bqd"}> : () -> ()
    %cst_90 = arith.constant dense<0.000000e+00> : vector<2x8x8xf32>
    %257 = tpu.matmul %256, %243, %cst_90 {dimension_numbers = #tpu.dot_dimension_numbers<[2], [1], [1], [2], [0, 0, 0, 1, 1, 2], [0], [0]>} : vector<2x8x8xf32>, vector<2x8x8xf32>, vector<2x8x8xf32> -> vector<2x8x8xf32>
    "tpu.trace_stop"() : () -> ()
    %258 = vector.shape_cast %257 : vector<2x8x8xf32> to vector<16x8xf32>
    %259 = vector.extract_strided_slice %189 {offsets = [8, 0], sizes = [8, 32], strides = [1, 1]} : vector<32x32xf32> to vector<8x32xf32>
    %cst_91 = arith.constant dense<0.000000e+00> : vector<16x32xf32>
    %260 = tpu.matmul %258, %259, %cst_91 {dimension_numbers = #tpu.dot_dimension_numbers<[1], [0], [0], [1], [0, 0, 1, 1], [], []>} : vector<16x8xf32>, vector<8x32xf32>, vector<16x32xf32> -> vector<16x32xf32>
    %261 = arith.addf %237, %260 : vector<16x32xf32>
    %262 = vector.extract_strided_slice %211 {offsets = [0, 16], sizes = [16, 8], strides = [1, 1]} : vector<16x32xf32> to vector<16x8xf32>
    %263 = vector.shape_cast %262 : vector<16x8xf32> to vector<2x8x8xf32>
    %264 = vector.extract_strided_slice %212 {offsets = [0, 16], sizes = [16, 8], strides = [1, 1]} : vector<16x32xf32> to vector<16x8xf32>
    %265 = vector.shape_cast %264 : vector<16x8xf32> to vector<2x8x8xf32>
    %266 = vector.extract_strided_slice %210 {offsets = [0, 16], sizes = [16, 8], strides = [1, 1]} : vector<16x32xf32> to vector<16x8xf32>
    %267 = vector.shape_cast %266 : vector<16x8xf32> to vector<2x8x8xf32>
    "tpu.trace_start"() <{level = 10 : i32, message = "bqd,bkd->bqk"}> : () -> ()
    %cst_92 = arith.constant dense<0.000000e+00> : vector<2x8x8xf32>
    %268 = tpu.matmul %263, %265, %cst_92 {dimension_numbers = #tpu.dot_dimension_numbers<[2], [2], [1], [1], [0, 0, 0, 1, 1, 1], [0], [0]>} : vector<2x8x8xf32>, vector<2x8x8xf32>, vector<2x8x8xf32> -> vector<2x8x8xf32>
    "tpu.trace_stop"() : () -> ()
    %cst_93 = arith.constant 0.353553385 : f32
    %269 = vector.broadcast %cst_93 : f32 to vector<2x8x8xf32>
    %270 = arith.mulf %268, %269 : vector<2x8x8xf32>
    %cst_94 = arith.constant dense<0xFF800000> : vector<2x8xf32>
    %271 = vector.multi_reduction <maximumf>, %270, %cst_94 [2] : vector<2x8x8xf32> to vector<2x8xf32>
    %272 = vector.shape_cast %271 : vector<2x8xf32> to vector<2x8x1xf32>
    %273 = vector.broadcast %272 : vector<2x8x1xf32> to vector<2x8x8xf32>
    %274 = arith.subf %270, %273 : vector<2x8x8xf32>
    %275 = math.exp %274 : vector<2x8x8xf32>
    %cst_95 = arith.constant dense<0.000000e+00> : vector<2x8xf32>
    %276 = vector.multi_reduction <add>, %275, %cst_95 [2] : vector<2x8x8xf32> to vector<2x8xf32>
    %277 = vector.shape_cast %276 : vector<2x8xf32> to vector<2x8x1xf32>
    %278 = tpu.reciprocal %277 {approx = true} : vector<2x8x1xf32> -> vector<2x8x1xf32>
    %279 = vector.broadcast %278 : vector<2x8x1xf32> to vector<2x8x8xf32>
    %280 = arith.mulf %275, %279 : vector<2x8x8xf32>
    "tpu.trace_start"() <{level = 10 : i32, message = "bqk,bkd->bqd"}> : () -> ()
    %cst_96 = arith.constant dense<0.000000e+00> : vector<2x8x8xf32>
    %281 = tpu.matmul %280, %267, %cst_96 {dimension_numbers = #tpu.dot_dimension_numbers<[2], [1], [1], [2], [0, 0, 0, 1, 1, 2], [0], [0]>} : vector<2x8x8xf32>, vector<2x8x8xf32>, vector<2x8x8xf32> -> vector<2x8x8xf32>
    "tpu.trace_stop"() : () -> ()
    %282 = vector.shape_cast %281 : vector<2x8x8xf32> to vector<16x8xf32>
    %283 = vector.extract_strided_slice %189 {offsets = [16, 0], sizes = [8, 32], strides = [1, 1]} : vector<32x32xf32> to vector<8x32xf32>
    %cst_97 = arith.constant dense<0.000000e+00> : vector<16x32xf32>
    %284 = tpu.matmul %282, %283, %cst_97 {dimension_numbers = #tpu.dot_dimension_numbers<[1], [0], [0], [1], [0, 0, 1, 1], [], []>} : vector<16x8xf32>, vector<8x32xf32>, vector<16x32xf32> -> vector<16x32xf32>
    %285 = arith.addf %261, %284 : vector<16x32xf32>
    %286 = vector.extract_strided_slice %211 {offsets = [0, 24], sizes = [16, 8], strides = [1, 1]} : vector<16x32xf32> to vector<16x8xf32>
    %287 = vector.shape_cast %286 : vector<16x8xf32> to vector<2x8x8xf32>
    %288 = vector.extract_strided_slice %212 {offsets = [0, 24], sizes = [16, 8], strides = [1, 1]} : vector<16x32xf32> to vector<16x8xf32>
    %289 = vector.shape_cast %288 : vector<16x8xf32> to vector<2x8x8xf32>
    %290 = vector.extract_strided_slice %210 {offsets = [0, 24], sizes = [16, 8], strides = [1, 1]} : vector<16x32xf32> to vector<16x8xf32>
    %291 = vector.shape_cast %290 : vector<16x8xf32> to vector<2x8x8xf32>
    "tpu.trace_start"() <{level = 10 : i32, message = "bqd,bkd->bqk"}> : () -> ()
    %cst_98 = arith.constant dense<0.000000e+00> : vector<2x8x8xf32>
    %292 = tpu.matmul %287, %289, %cst_98 {dimension_numbers = #tpu.dot_dimension_numbers<[2], [2], [1], [1], [0, 0, 0, 1, 1, 1], [0], [0]>} : vector<2x8x8xf32>, vector<2x8x8xf32>, vector<2x8x8xf32> -> vector<2x8x8xf32>
    "tpu.trace_stop"() : () -> ()
    %cst_99 = arith.constant 0.353553385 : f32
    %293 = vector.broadcast %cst_99 : f32 to vector<2x8x8xf32>
    %294 = arith.mulf %292, %293 : vector<2x8x8xf32>
    %cst_100 = arith.constant dense<0xFF800000> : vector<2x8xf32>
    %295 = vector.multi_reduction <maximumf>, %294, %cst_100 [2] : vector<2x8x8xf32> to vector<2x8xf32>
    %296 = vector.shape_cast %295 : vector<2x8xf32> to vector<2x8x1xf32>
    %297 = vector.broadcast %296 : vector<2x8x1xf32> to vector<2x8x8xf32>
    %298 = arith.subf %294, %297 : vector<2x8x8xf32>
    %299 = math.exp %298 : vector<2x8x8xf32>
    %cst_101 = arith.constant dense<0.000000e+00> : vector<2x8xf32>
    %300 = vector.multi_reduction <add>, %299, %cst_101 [2] : vector<2x8x8xf32> to vector<2x8xf32>
    %301 = vector.shape_cast %300 : vector<2x8xf32> to vector<2x8x1xf32>
    %302 = tpu.reciprocal %301 {approx = true} : vector<2x8x1xf32> -> vector<2x8x1xf32>
    %303 = vector.broadcast %302 : vector<2x8x1xf32> to vector<2x8x8xf32>
    %304 = arith.mulf %299, %303 : vector<2x8x8xf32>
    "tpu.trace_start"() <{level = 10 : i32, message = "bqk,bkd->bqd"}> : () -> ()
    %cst_102 = arith.constant dense<0.000000e+00> : vector<2x8x8xf32>
    %305 = tpu.matmul %304, %291, %cst_102 {dimension_numbers = #tpu.dot_dimension_numbers<[2], [1], [1], [2], [0, 0, 0, 1, 1, 2], [0], [0]>} : vector<2x8x8xf32>, vector<2x8x8xf32>, vector<2x8x8xf32> -> vector<2x8x8xf32>
    "tpu.trace_stop"() : () -> ()
    %306 = vector.shape_cast %305 : vector<2x8x8xf32> to vector<16x8xf32>
    %307 = vector.extract_strided_slice %189 {offsets = [24, 0], sizes = [8, 32], strides = [1, 1]} : vector<32x32xf32> to vector<8x32xf32>
    %cst_103 = arith.constant dense<0.000000e+00> : vector<16x32xf32>
    %308 = tpu.matmul %306, %307, %cst_103 {dimension_numbers = #tpu.dot_dimension_numbers<[1], [0], [0], [1], [0, 0, 1, 1], [], []>} : vector<16x8xf32>, vector<8x32xf32>, vector<16x32xf32> -> vector<16x32xf32>
    %309 = arith.addf %285, %308 : vector<16x32xf32>
    %310 = vector.broadcast %198 : vector<1x32xf32> to vector<16x32xf32>
    %311 = arith.addf %309, %310 : vector<16x32xf32>
    %312 = arith.addf %184, %311 : vector<16x32xf32>
    %cst_104 = arith.constant dense<0.000000e+00> : vector<16xf32>
    %313 = vector.multi_reduction <add>, %312, %cst_104 [1] : vector<16x32xf32> to vector<16xf32>
    %314 = vector.shape_cast %313 : vector<16xf32> to vector<16x1xf32>
    %cst_105 = arith.constant 3.200000e+01 : f32
    %315 = vector.broadcast %cst_105 : f32 to vector<16x1xf32>
    %316 = arith.divf %314, %315 : vector<16x1xf32>
    %317 = vector.broadcast %316 : vector<16x1xf32> to vector<16x32xf32>
    %318 = arith.subf %312, %317 : vector<16x32xf32>
    %319 = arith.mulf %318, %318 : vector<16x32xf32>
    %cst_106 = arith.constant dense<0.000000e+00> : vector<16xf32>
    %320 = vector.multi_reduction <add>, %319, %cst_106 [1] : vector<16x32xf32> to vector<16xf32>
    %321 = vector.shape_cast %320 : vector<16xf32> to vector<16x1xf32>
    %cst_107 = arith.constant 3.200000e+01 : f32
    %322 = vector.broadcast %cst_107 : f32 to vector<16x1xf32>
    %323 = arith.divf %321, %322 : vector<16x1xf32>
    %324 = vector.broadcast %316 : vector<16x1xf32> to vector<16x32xf32>
    %325 = arith.subf %312, %324 : vector<16x32xf32>
    %cst_108 = arith.constant 9.99999974E-6 : f32
    %326 = vector.broadcast %cst_108 : f32 to vector<16x1xf32>
    %327 = arith.addf %323, %326 : vector<16x1xf32>
    %328 = math.rsqrt %327 : vector<16x1xf32>
    %329 = vector.broadcast %328 : vector<16x1xf32> to vector<16x32xf32>
    %330 = arith.mulf %325, %329 : vector<16x32xf32>
    %331 = vector.broadcast %200 : vector<1x32xf32> to vector<16x32xf32>
    %332 = arith.mulf %330, %331 : vector<16x32xf32>
    %333 = vector.broadcast %201 : vector<1x32xf32> to vector<16x32xf32>
    %334 = arith.addf %332, %333 : vector<16x32xf32>
    %cst_109 = arith.constant dense<0.000000e+00> : vector<16x64xf32>
    %335 = tpu.matmul %334, %190, %cst_109 {dimension_numbers = #tpu.dot_dimension_numbers<[1], [0], [0], [1], [0, 0, 1, 1], [], []>} : vector<16x32xf32>, vector<32x64xf32>, vector<16x64xf32> -> vector<16x64xf32>
    %336 = vector.broadcast %196 : vector<1x64xf32> to vector<16x64xf32>
    %337 = arith.addf %335, %336 : vector<16x64xf32>
    %cst_110 = arith.constant 0.000000e+00 : f32
    %338 = vector.broadcast %cst_110 : f32 to vector<16x64xf32>
    %339 = arith.maximumf %337, %338 : vector<16x64xf32>
    %cst_111 = arith.constant dense<0.000000e+00> : vector<16x32xf32>
    %340 = tpu.matmul %339, %192, %cst_111 {dimension_numbers = #tpu.dot_dimension_numbers<[1], [0], [0], [1], [0, 0, 1, 1], [], []>} : vector<16x64xf32>, vector<64x32xf32>, vector<16x32xf32> -> vector<16x32xf32>
    %341 = vector.broadcast %199 : vector<1x32xf32> to vector<16x32xf32>
    %342 = arith.addf %340, %341 : vector<16x32xf32>
    %343 = arith.addf %334, %342 : vector<16x32xf32>
    %cst_112 = arith.constant dense<0.000000e+00> : vector<16xf32>
    %344 = vector.multi_reduction <add>, %343, %cst_112 [1] : vector<16x32xf32> to vector<16xf32>
    %345 = vector.shape_cast %344 : vector<16xf32> to vector<16x1xf32>
    %cst_113 = arith.constant 3.200000e+01 : f32
    %346 = vector.broadcast %cst_113 : f32 to vector<16x1xf32>
    %347 = arith.divf %345, %346 : vector<16x1xf32>
    %348 = vector.broadcast %347 : vector<16x1xf32> to vector<16x32xf32>
    %349 = arith.subf %343, %348 : vector<16x32xf32>
    %350 = arith.mulf %349, %349 : vector<16x32xf32>
    %cst_114 = arith.constant dense<0.000000e+00> : vector<16xf32>
    %351 = vector.multi_reduction <add>, %350, %cst_114 [1] : vector<16x32xf32> to vector<16xf32>
    %352 = vector.shape_cast %351 : vector<16xf32> to vector<16x1xf32>
    %cst_115 = arith.constant 3.200000e+01 : f32
    %353 = vector.broadcast %cst_115 : f32 to vector<16x1xf32>
    %354 = arith.divf %352, %353 : vector<16x1xf32>
    %355 = vector.broadcast %347 : vector<16x1xf32> to vector<16x32xf32>
    %356 = arith.subf %343, %355 : vector<16x32xf32>
    %cst_116 = arith.constant 9.99999974E-6 : f32
    %357 = vector.broadcast %cst_116 : f32 to vector<16x1xf32>
    %358 = arith.addf %354, %357 : vector<16x1xf32>
    %359 = math.rsqrt %358 : vector<16x1xf32>
    %360 = vector.broadcast %359 : vector<16x1xf32> to vector<16x32xf32>
    %361 = arith.mulf %356, %360 : vector<16x32xf32>
    %362 = vector.broadcast %202 : vector<1x32xf32> to vector<16x32xf32>
    %363 = arith.mulf %361, %362 : vector<16x32xf32>
    %364 = vector.broadcast %203 : vector<1x32xf32> to vector<16x32xf32>
    %365 = arith.addf %363, %364 : vector<16x32xf32>
    %c14 = arith.constant 14 : index
    %c0_117 = arith.constant 0 : index
    %366 = vector.load %arg6[%c14, %c0_117] : memref<16x32xf32, #tpu.memory_space<vmem>>, vector<1x32xf32>
    %c15 = arith.constant 15 : index
    %c0_118 = arith.constant 0 : index
    %367 = vector.load %arg6[%c15, %c0_118] : memref<16x32xf32, #tpu.memory_space<vmem>>, vector<1x32xf32>
    %cst_119 = arith.constant dense<0.000000e+00> : vector<16xf32>
    %368 = vector.multi_reduction <add>, %365, %cst_119 [1] : vector<16x32xf32> to vector<16xf32>
    %369 = vector.shape_cast %368 : vector<16xf32> to vector<16x1xf32>
    %cst_120 = arith.constant 3.200000e+01 : f32
    %370 = vector.broadcast %cst_120 : f32 to vector<16x1xf32>
    %371 = arith.divf %369, %370 : vector<16x1xf32>
    %372 = vector.broadcast %371 : vector<16x1xf32> to vector<16x32xf32>
    %373 = arith.subf %365, %372 : vector<16x32xf32>
    %374 = arith.mulf %373, %373 : vector<16x32xf32>
    %cst_121 = arith.constant dense<0.000000e+00> : vector<16xf32>
    %375 = vector.multi_reduction <add>, %374, %cst_121 [1] : vector<16x32xf32> to vector<16xf32>
    %376 = vector.shape_cast %375 : vector<16xf32> to vector<16x1xf32>
    %cst_122 = arith.constant 3.200000e+01 : f32
    %377 = vector.broadcast %cst_122 : f32 to vector<16x1xf32>
    %378 = arith.divf %376, %377 : vector<16x1xf32>
    %379 = vector.broadcast %371 : vector<16x1xf32> to vector<16x32xf32>
    %380 = arith.subf %365, %379 : vector<16x32xf32>
    %cst_123 = arith.constant 9.99999974E-6 : f32
    %381 = vector.broadcast %cst_123 : f32 to vector<16x1xf32>
    %382 = arith.addf %378, %381 : vector<16x1xf32>
    %383 = math.rsqrt %382 : vector<16x1xf32>
    %384 = vector.broadcast %383 : vector<16x1xf32> to vector<16x32xf32>
    %385 = arith.mulf %380, %384 : vector<16x32xf32>
    %386 = vector.broadcast %366 : vector<1x32xf32> to vector<16x32xf32>
    %387 = arith.mulf %385, %386 : vector<16x32xf32>
    %388 = vector.broadcast %367 : vector<1x32xf32> to vector<16x32xf32>
    %389 = arith.addf %387, %388 : vector<16x32xf32>
    %390 = vector.shape_cast %389 : vector<16x32xf32> to vector<2x8x32xf32>
    %c0_124 = arith.constant 0 : index
    %c0_125 = arith.constant 0 : index
    %c0_126 = arith.constant 0 : index
    %391 = vector.load %arg7[%c0_124, %c0_125, %c0_126] : memref<2x8x32xf32, #tpu.memory_space<vmem>>, vector<2x8x32xf32>
    tpu.vector_store %arg7[%c0_124, %c0_125, %c0_126], %390 {strides = array<i32>} : memref<2x8x32xf32, #tpu.memory_space<vmem>>, vector<2x8x32xf32>,
    return
  }
  func.func @transform_0(%arg0: i32) -> (i32, i32, i32) {
    %c0_i32 = arith.constant 0 : i32
    %c0_i32_0 = arith.constant 0 : i32
    %c0_i32_1 = arith.constant 0 : i32
    %c0_i32_2 = arith.constant 0 : i32
    return %c0_i32, %c0_i32_0, %c0_i32_1 : i32, i32, i32
  }
  func.func @transform_1(%arg0: i32) -> (i32, i32, i32) {
    %c0_i32 = arith.constant 0 : i32
    %c0_i32_0 = arith.constant 0 : i32
    %c0_i32_1 = arith.constant 0 : i32
    %c0_i32_2 = arith.constant 0 : i32
    return %c0_i32, %c0_i32_0, %c0_i32_1 : i32, i32, i32
  }
  func.func @transform_2(%arg0: i32) -> (i32, i32, i32) {
    %c0_i32 = arith.constant 0 : i32
    %c0_i32_0 = arith.constant 0 : i32
    %c0_i32_1 = arith.constant 0 : i32
    %c0_i32_2 = arith.constant 0 : i32
    return %c0_i32, %c0_i32_0, %c0_i32_1 : i32, i32, i32
  }
  func.func @transform_3(%arg0: i32) -> (i32, i32, i32) {
    %c0_i32 = arith.constant 0 : i32
    %c0_i32_0 = arith.constant 0 : i32
    %c0_i32_1 = arith.constant 0 : i32
    %c0_i32_2 = arith.constant 0 : i32
    return %c0_i32, %c0_i32_0, %c0_i32_1 : i32, i32, i32
  }
  func.func @transform_4(%arg0: i32) -> (i32, i32, i32) {
    %c0_i32 = arith.constant 0 : i32
    %c0_i32_0 = arith.constant 0 : i32
    %c0_i32_1 = arith.constant 0 : i32
    %c0_i32_2 = arith.constant 0 : i32
    return %c0_i32, %c0_i32_0, %c0_i32_1 : i32, i32, i32
  }
  func.func @transform_5(%arg0: i32) -> (i32, i32) {
    %c0_i32 = arith.constant 0 : i32
    %c0_i32_0 = arith.constant 0 : i32
    %c0_i32_1 = arith.constant 0 : i32
    return %c0_i32, %c0_i32_0 : i32, i32
  }
  func.func @transform_6(%arg0: i32) -> (i32, i32, i32) {
    %c0_i32 = arith.constant 0 : i32
    %c0_i32_0 = arith.constant 0 : i32
    %c0_i32_1 = arith.constant 0 : i32
    %c0_i32_2 = arith.constant 0 : i32
    return %c0_i32, %c0_i32_0, %c0_i32_1 : i32, i32, i32
  }
}

</mosaic_0001>

<bundles_post_ra>
// kernel: transformer_encoder.1
= control target key start
LH: loop header
LB: loop body
LE: loop exit
PB: predicated region body
PF: predicated region fallthrough
CT: control target
= control target key end

     0   :  { %vm55_vm0 = vcmask 261120   ;;  %s2820_s0 = inlined_call_operand.vmem [shape: f32[2,8,32], index: 0, kind: input, shape index: {}]   ;;  %s2821_s1 = inlined_call_operand.vmem [shape: f32[2,8,32], index: 1, kind: input, shape index: {}]   ;;  %s2822_s2 = inlined_call_operand.vmem [shape: f32[2,32,192], index: 2, kind: input, shape index: {}]   ;;  %s2823_s3 = inlined_call_operand.vmem [shape: f32[2,64,32], index: 3, kind: input, shape index: {}]   ;;  %s2824_s4 = inlined_call_operand.vmem [shape: f32[2,2,64], index: 4, kind: input, shape index: {}]   ;;  %s2825_s5 = inlined_call_operand.vmem [shape: f32[16,32], index: 5, kind: input, shape index: {}]   ;;  %s2826_s6 = inlined_call_operand.hbm [shape: f32[2,8,32], index: 6, kind: output, shape index: {}]  }
   0x1   :  { %v2282_v0 = vld [vmem:[%s2822_s2 + $0x30] sm:$0xff]  ;;  %v2287_v1 = vld [vmem:[%s2822_s2 + $0x20] sm:$0xff]  ;;  %v2319_v7 = vld [vmem:[%s2820_s0 + $0x8] sm:$0xff] }
   0x2   :  { %74 = vmatpush.msra.mxu0 %v2282_v0  ;;  %v2293_v2 = vld [vmem:[%s2820_s0] sm:$0xff]  ;;  %v2303_v4 = vld [vmem:[%s2822_s2 + $0x10] sm:$0xff]  ;;  %v2324_v8 = vld [vmem:[%s2821_s1 + $0x8] sm:$0xff] }
   0x3   :  { %v2298_v3 = vld [vmem:[%s2821_s1] sm:$0xff] }
   0x4   :  { %75 = vmatpush.msra.mxu0 %v2287_v1  ;;  %v2309_v5 = vld [vmem:[%s2822_s2] sm:$0xff]  ;;  %v52_v6 = vadd.f32 %v2298_v3, %v2293_v2 }
   0x6   :  { %76 = vmatpush.msra.mxu0 %v2303_v4 }
   0x8   :  { %77 = vmatpush.msra.mxu0 %v2309_v5 }
   0x9   :  { %1963 = vmatmul.msk.f32.vlgmr.msra.gmra.mxu0 %vm55_vm0, %v52_v6 }
   0xa   :  { %11 = vsyncpa [#allocation3], 0  ;;  %v53_v9 = vadd.f32 %v2324_v8, %v2319_v7  ;;  %v2078_v10 = vpack.i.bf16 %v2309_v5, %v2303_v4  ;;  %s2231_s13 = smov 64   ;;  %v2335_v11 = vld [vmem:[%s2824_s4] sm:$0x3]  ;;  %s2232_s1 = smov 96   ;;  %v2073_v15 = vpack.i.bf16 %v2287_v1, %v2282_v0 }
   0xb   :  { %v54_v12 = vperm.slane %v2335_v11, 0  ;;  %s2233_s15 = smov 88   ;;  %s2234_s16 = smov 120   ;;  %vm134_vm1 = vcmask 64512   ;;  %v2103_v29 = vld [vmem:[%s2825_s5] ss:$0 sm:$0xff] }
   0xc   :  { %2079 = vrot.lane.b32.xlu1 %v2078_v10, %s2231_s13  ;;  %s2235_s19 = smov 80   ;;  %s2236_s20 = smov 112   ;;  %vm881_vm9 = vcmask 523264  }
   0xd   :  { %s2237_s21 = smov 72   ;;  %s2238_s22 = smov 32  }
   0xe   :  { %s2239_s23 = smov 104   ;;  %s2241_s17 = smov [#allocation2]  }
   0xf   :  { %s1949_s18 = sshll.u32 %s2241_s17, 4  ;;  %s1951_s26 = sshll.u32 %s2826_s6, 4  ;;  %s1950_s18 = int_to_ptr.vmem [resolvable:$true] %s1949_s18  ;;  %s1952_s26 = int_to_ptr.hbm [resolvable:$true] %s1951_s26 }
  0x11   :  { %1964 = vmatmul.msk.f32.gmra.mxu0 %vm55_vm0, %v53_v9 }
  0x7e   :  { %v2080_v21 = vpop.permute.xlu1 %2079 }
  0x7f   :  { %v2081_v24 = vunpack.i.l.bf16 %v2080_v21  ;;  %v2082_v25 = vunpack.i.h.bf16 %v2080_v21 }
  0x86   :  { %v79_v13 = vpop.f32.mrf.mxu0 }
  0x87   :  { %v2338_v14 = vadd.f32 %v79_v13, %v54_v12 }
  0x89   :  { %132 = vrot.lane.b32.xlu0 %v2338_v14, %s2232_s1 }
  0x8e   :  { %v82_v16 = vpop.f32.mrf.mxu0 }
  0x8f   :  { %v2344_v17 = vadd.f32 %v82_v16, %v54_v12 }
  0x91   :  { %2074 = vrot.lane.b32.xlu0 %v2073_v15, %s2231_s13  ;;  %160 = vrot.lane.b32.xlu2 %v2344_v17, %s2232_s1 }
  0x99   :  { %258 = vrot.lane.b32.xlu0 %v2338_v14, %s2233_s15 }
  0xa1   :  { %256 = vrot.lane.b32.xlu0 %v2338_v14, %s2234_s16 }
  0xeb   :  { %v161_v18 = vpop.permute.xlu2 %160 }
  0xfb   :  { %v133_v19 = vpop.permute.xlu0 %132 }
  0xfc   :  { %1967 = vmatpush.xpose.msk.msra.mxu3 %vm134_vm1, %v133_v19 }
  0xff   :  { %1968 = vmatmul.msk.f32.vlgmr.msra.gmra.mxu3 %vm134_vm1, %v2338_v14 }
 0x100   :  { %1969 = vmatpush.xpose.msk.msrb.mxu3 %vm134_vm1, %v161_v18 }
 0x103   :  { %v2075_v20 = vpop.permute.xlu0 %2074 }
 0x104   :  { %v2076_v22 = vunpack.i.l.bf16 %v2075_v20  ;;  %v2077_v23 = vunpack.i.h.bf16 %v2075_v20 }
 0x106   :  { %120 = vmatpush.msra.mxu1 %v2076_v22 }
 0x107   :  { %1970 = vmatmul.msk.f32.vlgmr.msrb.gmra.mxu3 %vm134_vm1, %v2344_v17 }
 0x108   :  { %121 = vmatpush.msra.mxu1 %v2077_v23 }
 0x10a   :  { %122 = vmatpush.msra.mxu1 %v2081_v24 }
 0x10b   :  { %v259_v34 = vpop.permute.xlu0 %258 }
 0x10c   :  { %123 = vmatpush.msra.mxu1 %v2082_v25 }
 0x10d   :  { %1965 = vmatmul.msk.f32.vlgmr.msra.gmra.mxu1 %vm55_vm0, %v2293_v2 }
 0x113   :  { %v257_v36 = vpop.permute.xlu0 %256 }
 0x115   :  { %1966 = vmatmul.msk.f32.gmra.mxu1 %vm55_vm0, %v2319_v7 }
 0x182   :  { %v156_v26 = vpop.f32.mrf.mxu3 }
 0x183   :  { %v186_v27 = vmul.f32 0.35355338, %v156_v26 }
 0x185   :  { %v188_v28 = vsel %vm134_vm1, %v186_v27, -inf }
 0x186   :  { %189 = vmax.xlane.f32.xlu1 %v188_v28 }
 0x18a   :  { %v125_v30 = vpop.f32.mrf.mxu1  ;;  %v183_v31 = vpop.f32.mrf.mxu3 }
 0x18b   :  { %v2367_v32 = vadd.f32 %v2103_v29, %v125_v30  ;;  %v187_v33 = vmul.f32 0.35355338, %v183_v31 }
 0x18d   :  { %228 = vmatpush.msra.mxu2 %v2367_v32  ;;  %v191_v35 = vsel %vm134_vm1, %v187_v33, -inf }
 0x18e   :  { %192 = vmax.xlane.f32.xlu0 %v191_v35 }
 0x18f   :  { %1973 = vmatpush.xpose.msk.msrb.mxu2 %vm134_vm1, %v259_v34 }
 0x192   :  { %v128_v47 = vpop.f32.mrf.mxu1 }
 0x193   :  { %v2376_v48 = vadd.f32 %v2103_v29, %v128_v47 }
 0x195   :  { %251 = vmatpush.msra.mxu3 %v2376_v48 }
 0x1a2   :  { %337 = vrot.lane.b32.xlu0 %v2367_v32, %s2234_s16 }
 0x1f9   :  { %v190_v37 = vpop.xlane.xlu1 %189 }
 0x1fa   :  { %v194_v38 = vsub.f32 %v186_v27, %v190_v37 }
 0x1fc   :  { %v196_v39 = vmul.f32 1.442695, %v194_v38 }
 0x1fe   :  { %2119 = vpow2.f32 %v196_v39 }
 0x201   :  { %v193_v40 = vpop.xlane.xlu0 %192 }
 0x202   :  { %v195_v41 = vsub.f32 %v187_v33, %v193_v40 }
 0x204   :  { %v2120_v42 = vpop.eup %2119  ;;  %v198_v43 = vmul.f32 1.442695, %v195_v41 }
 0x205   :  { %v200_v44 = vsel %vm134_vm1, %v2120_v42, 0.0 }
 0x206   :  { %2121 = vpow2.f32 %v198_v43  ;;  %201 = vadd.xlane.f32.xlu2 %v200_v44 }
 0x20c   :  { %v2122_v45 = vpop.eup %2121 }
 0x20d   :  { %v203_v46 = vsel %vm134_vm1, %v2122_v45, 0.0 }
 0x20e   :  { %204 = vadd.xlane.f32.xlu1 %v203_v46 }
 0x214   :  { %v338_v49 = vpop.permute.xlu0 %337 }
 0x215   :  { %358 = vmatpush.msrb.mxu0 %v338_v49 }
 0x279   :  { %v202_v50 = vpop.xlane.xlu2 %201 }
 0x27a   :  { %2123 = vrcp.f32 %v202_v50 }
 0x280   :  { %v2124_v51 = vpop.eup %2123 }
 0x281   :  { %v205_v52 = vpop.xlane.xlu1 %204  ;;  %v208_v53 = vmul.f32 %v2124_v51, %v2120_v42 }
 0x282   :  { %2125 = vrcp.f32 %v205_v52 }
 0x283   :  { %1971 = vmatmul.msk.f32.vlgmr.msra.gmra.mxu2 %vm134_vm1, %v208_v53 }
 0x288   :  { %v2126_v54 = vpop.eup %2125 }
 0x289   :  { %v209_v55 = vmul.f32 %v2126_v54, %v2122_v45 }
 0x28b   :  { %1972 = vmatmul.msk.f32.vlgmr.msra.gmra.mxu3 %vm134_vm1, %v209_v55  ;;  %1974 = vmatmul.msk.f32.vlgmr.msrb.gmra.mxu2 %vm134_vm1, %v257_v36 }
 0x306   :  { %v2382_v56 = vpop.f32.mrf.mxu2 }
 0x30e   :  { %v281_v57 = vpop.f32.mrf.mxu2  ;;  %v253_v23 = vpop.f32.mrf.mxu3 }
 0x30f   :  { %v312_v58 = vmul.f32 0.35355338, %v281_v57 }
 0x311   :  { %v314_v59 = vsel %vm134_vm1, %v312_v58, -inf }
 0x312   :  { %315 = vmax.xlane.f32.xlu2 %v314_v59 }
 0x32a   :  { %286 = vrot.lane.b32.xlu2 %v2344_v17, %s2233_s15 }
 0x332   :  { %456 = vrot.lane.b32.xlu2 %v2338_v14, %s2235_s19 }
 0x33a   :  { %454 = vrot.lane.b32.xlu2 %v2338_v14, %s2236_s20 }
 0x385   :  { %v316_v60 = vpop.xlane.xlu2 %315 }
 0x386   :  { %v320_v61 = vsub.f32 %v312_v58, %v316_v60 }
 0x388   :  { %v322_v62 = vmul.f32 1.442695, %v320_v61 }
 0x38a   :  { %2127 = vpow2.f32 %v322_v62 }
 0x38d   :  { %v287_v63 = vpop.permute.xlu2 %286 }
 0x38e   :  { %1975 = vmatpush.xpose.msk.msrb.mxu3 %vm134_vm1, %v287_v63 }
 0x390   :  { %v2128_v6 = vpop.eup %2127 }
 0x391   :  { %v326_v9 = vsel %vm134_vm1, %v2128_v6, 0.0 }
 0x392   :  { %327 = vadd.xlane.f32.xlu1 %v326_v9  ;;  %v2083_v9 = vpack.i.bf16 %v2376_v48, %v2367_v32 }
 0x395   :  { %v457_v10 = vpop.permute.xlu2 %456 }
 0x396   :  { %1983 = vmatpush.xpose.msk.msra.mxu0 %vm134_vm1, %v457_v10 }
 0x39d   :  { %v455_v16 = vpop.permute.xlu2 %454 }
 0x3ab   :  { %284 = vrot.lane.b32.xlu1 %v2344_v17, %s2234_s16 }
 0x405   :  { %v328_v12 = vpop.xlane.xlu1 %327 }
 0x406   :  { %2129 = vrcp.f32 %v328_v12 }
 0x40c   :  { %v2130_v13 = vpop.eup %2129 }
 0x40d   :  { %v334_v15 = vmul.f32 %v2130_v13, %v2128_v6 }
 0x40f   :  { %1977 = vmatmul.msk.f32.vlgmr.msrb.gmra.mxu0 %vm134_vm1, %v334_v15 }
 0x417   :  { %1984 = vmatmul.msk.f32.vlgmr.msra.gmra.mxu0 %vm134_vm1, %v455_v16 }
 0x41d   :  { %v285_v18 = vpop.permute.xlu1 %284 }
 0x41e   :  { %1976 = vmatmul.msk.f32.vlgmr.msrb.gmra.mxu3 %vm134_vm1, %v285_v18 }
 0x48c   :  { %v2399_v19 = vpop.f32.mrf.mxu0 }
 0x494   :  { %v479_v20 = vpop.f32.mrf.mxu0 }
 0x495   :  { %v510_v21 = vmul.f32 0.35355338, %v479_v20 }
 0x497   :  { %v512_v22 = vsel %vm134_vm1, %v510_v21, -inf }
 0x498   :  { %513 = vmax.xlane.f32.xlu0 %v512_v22 }
 0x4a1   :  { %v309_v24 = vpop.f32.mrf.mxu3 }
 0x4a2   :  { %v313_v25 = vmul.f32 0.35355338, %v309_v24 }
 0x4a4   :  { %v317_v26 = vsel %vm134_vm1, %v313_v25, -inf }
 0x4a5   :  { %318 = vmax.xlane.f32.xlu1 %v317_v26 }
 0x4ac   :  { %364 = vrot.lane.b32.xlu0 %v2376_v48, %s2234_s16 }
 0x4b4   :  { %622 = vrot.lane.b32.xlu0 %v2338_v14, %s2237_s21 }
 0x4bc   :  { %534 = vrot.lane.b32.xlu0 %v2367_v32, %s2236_s20 }
 0x4be   :  { %422 = vrot.lane.b32.xlu1 %v2309_v5, %s2238_s22 }
 0x4c4   :  { %648 = vrot.lane.b32.xlu0 %v2344_v17, %s2239_s23 }
 0x4c6   :  { %482 = vrot.lane.b32.xlu1 %v2344_v17, %s2236_s20 }
 0x4ce   :  { %620 = vrot.lane.b32.xlu1 %v2338_v14, %s2239_s23 }
 0x50b   :  { %v514_v27 = vpop.xlane.xlu0 %513 }
 0x50c   :  { %v518_v38 = vsub.f32 %v510_v21, %v514_v27 }
 0x50e   :  { %v520_v39 = vmul.f32 1.442695, %v518_v38 }
 0x518   :  { %v319_v28 = vpop.xlane.xlu1 %318 }
 0x519   :  { %v321_v29 = vsub.f32 %v313_v25, %v319_v28 }
 0x51b   :  { %v324_v30 = vmul.f32 1.442695, %v321_v29 }
 0x51d   :  { %2131 = vpow2.f32 %v324_v30 }
 0x51e   :  { %v365_v31 = vpop.permute.xlu0 %364  ;;  %2133 = vpow2.f32 %v520_v39 }
 0x51f   :  { %385 = vmatpush.msrb.mxu1 %v365_v31 }
 0x523   :  { %v2132_v33 = vpop.eup %2131 }
 0x524   :  { %v329_v5 = vsel %vm134_vm1, %v2132_v33, 0.0  ;;  %v2134_v40 = vpop.eup %2133 }
 0x525   :  { %330 = vadd.xlane.f32.xlu2 %v329_v5  ;;  %v524_v41 = vsel %vm134_vm1, %v2134_v40, 0.0 }
 0x526   :  { %v623_v34 = vpop.permute.xlu0 %622 }
 0x52e   :  { %v535_v35 = vpop.permute.xlu0 %534 }
 0x52f   :  { %555 = vmatpush.msrb.mxu0 %v535_v35 }
 0x530   :  { %v423_v36 = vpop.permute.xlu1 %422 }
 0x531   :  { %446 = vmatpush.msra.mxu3 %v423_v36 }
 0x532   :  { %1981 = vmatmul.msk.f32.vlgmr.msra.gmra.mxu3 %vm134_vm1, %v2382_v56 }
 0x533   :  { %1991 = vmatpush.xpose.msk.msrb.mxu3 %vm134_vm1, %v623_v34 }
 0x536   :  { %v649_v55 = vpop.permute.xlu0 %648 }
 0x538   :  { %v483_v14 = vpop.permute.xlu1 %482 }
 0x53a   :  { %1982 = vmatmul.msk.f32.gmra.mxu3 %vm134_vm1, %v253_v23 }
 0x53d   :  { %484 = vrot.lane.b32.xlu2 %v2344_v17, %s2235_s19 }
 0x540   :  { %v621_v37 = vpop.permute.xlu1 %620 }
 0x542   :  { %1992 = vmatmul.msk.f32.vlgmr.msrb.gmra.mxu3 %vm134_vm1, %v621_v37 }
 0x566   :  { %525 = vadd.xlane.f32.xlu2 %v524_v41 }
 0x57e   :  { %650 = vrot.lane.b32.xlu2 %v2344_v17, %s2237_s21 }
 0x598   :  { %v331_v42 = vpop.xlane.xlu2 %330 }
 0x599   :  { %2135 = vrcp.f32 %v331_v42 }
 0x59f   :  { %v2136_v43 = vpop.eup %2135 }
 0x5a0   :  { %v485_v44 = vpop.permute.xlu2 %484  ;;  %v335_v45 = vmul.f32 %v2136_v43, %v2132_v33 }
 0x5a1   :  { %1985 = vmatpush.xpose.msk.msra.mxu1 %vm134_vm1, %v485_v44 }
 0x5a2   :  { %1978 = vmatmul.msk.f32.vlgmr.msrb.gmra.mxu1 %vm134_vm1, %v335_v45  ;;  %v2104_v45 = vld [vmem:[%s2825_s5 + $0x1] ss:$0 sm:$0xff] }
 0x5aa   :  { %1986 = vmatmul.msk.f32.vlgmr.msra.gmra.mxu1 %vm134_vm1, %v483_v14 }
 0x5b5   :  { %v2431_v46 = vpop.f32.mrf.mxu3 }
 0x5bd   :  { %v2433_v47 = vpop.f32.mrf.mxu3 }
 0x5c5   :  { %v645_v49 = vpop.f32.mrf.mxu3 }
 0x5c6   :  { %v676_v50 = vmul.f32 0.35355338, %v645_v49 }
 0x5c8   :  { %v678_v51 = vsel %vm134_vm1, %v676_v50, -inf }
 0x5c9   :  { %679 = vmax.xlane.f32.xlu2 %v678_v51 }
 0x5d9   :  { %v526_v17 = vpop.xlane.xlu2 %525 }
 0x5da   :  { %2137 = vrcp.f32 %v526_v17 }
 0x5e0   :  { %v2138_v52 = vpop.eup %2137 }
 0x5e1   :  { %v532_v53 = vmul.f32 %v2138_v52, %v2134_v40  ;;  %v651_v54 = vpop.permute.xlu2 %650 }
 0x5e2   :  { %1993 = vmatpush.xpose.msk.msra.mxu0 %vm134_vm1, %v651_v54 }
 0x5e3   :  { %1987 = vmatmul.msk.f32.vlgmr.msrb.gmra.mxu0 %vm134_vm1, %v532_v53 }
 0x5eb   :  { %1994 = vmatmul.msk.f32.vlgmr.msra.gmra.mxu0 %vm134_vm1, %v649_v55 }
 0x61f   :  { %v2439_v56 = vpop.f32.mrf.mxu1 }
 0x627   :  { %v507_v57 = vpop.f32.mrf.mxu1 }
 0x628   :  { %v511_v58 = vmul.f32 0.35355338, %v507_v57 }
 0x62a   :  { %v515_v59 = vsel %vm134_vm1, %v511_v58, -inf }
 0x62b   :  { %516 = vmax.xlane.f32.xlu1 %v515_v59 }
 0x63c   :  { %v680_v60 = vpop.xlane.xlu2 %679 }
 0x63d   :  { %v684_v61 = vsub.f32 %v676_v50, %v680_v60  ;;  %v2240_v60 = vmov 32.0  }
 0x63f   :  { %v686_v62 = vmul.f32 1.442695, %v684_v61 }
 0x641   :  { %2139 = vpow2.f32 %v686_v62 }
 0x647   :  { %v2140_v63 = vpop.eup %2139 }
 0x648   :  { %v690_v6 = vsel %vm134_vm1, %v2140_v63, 0.0 }
 0x649   :  { %691 = vadd.xlane.f32.xlu2 %v690_v6 }
 0x660   :  { %v557_v10 = vpop.f32.mrf.mxu0 }
 0x661   :  { %2084 = vrot.lane.b32.xlu2 %v2083_v9, %s2239_s23 }
 0x668   :  { %v673_v12 = vpop.f32.mrf.mxu0 }
 0x669   :  { %v677_v13 = vmul.f32 0.35355338, %v673_v12 }
 0x66b   :  { %v681_v15 = vsel %vm134_vm1, %v677_v13, -inf }
 0x66c   :  { %682 = vmax.xlane.f32.xlu0 %v681_v15 }
 0x680   :  { %560 = vrot.lane.b32.xlu0 %v2376_v48, %s2236_s20 }
 0x688   :  { %586 = vrot.lane.b32.xlu0 %v2287_v1, %s2238_s22 }
 0x690   :  { %752 = vrot.lane.b32.xlu0 %v2282_v0, %s2238_s22 }
 0x69e   :  { %v517_v16 = vpop.xlane.xlu1 %516 }
 0x69f   :  { %v519_v18 = vsub.f32 %v511_v58, %v517_v16 }
 0x6a1   :  { %v522_v32 = vmul.f32 1.442695, %v519_v18 }
 0x6a3   :  { %2141 = vpow2.f32 %v522_v32 }
 0x6a9   :  { %v2142_v20 = vpop.eup %2141 }
 0x6aa   :  { %v527_v21 = vsel %vm134_vm1, %v2142_v20, 0.0 }
 0x6ab   :  { %528 = vadd.xlane.f32.xlu1 %v527_v21  ;;  %v35_v21 = vld [vmem:[%s2822_s2 + $0x38] sm:$0xff] }
 0x6bc   :  { %v692_v22 = vpop.xlane.xlu2 %691 }
 0x6c4   :  { %v2085_v23 = vpop.permute.xlu2 %2084 }
 0x6c5   :  { %v2087_v24 = vunpack.i.h.bf16 %v2085_v23  ;;  %v2086_v0 = vunpack.i.l.bf16 %v2085_v23  ;;  %v31_v23 = vld [vmem:[%s2822_s2 + $0x18] sm:$0xff] }
 0x6c7   :  { %747 = vmatpush.msra.mxu3 %v2087_v24  ;;  %v29_v24 = vld [vmem:[%s2822_s2 + $0x8] sm:$0xff] }
 0x6df   :  { %v683_v25 = vpop.xlane.xlu0 %682 }
 0x6e0   :  { %v685_v48 = vsub.f32 %v677_v13, %v683_v25 }
 0x6e2   :  { %v688_v26 = vmul.f32 1.442695, %v685_v48 }
 0x6e4   :  { %2143 = vpow2.f32 %v688_v26 }
 0x6ea   :  { %v2144_v1 = vpop.eup %2143 }
 0x6eb   :  { %v693_v27 = vsel %vm134_vm1, %v2144_v1, 0.0 }
 0x6ec   :  { %694 = vadd.xlane.f32.xlu1 %v693_v27 }
 0x6f2   :  { %v561_v28 = vpop.permute.xlu0 %560 }
 0x6f3   :  { %581 = vmatpush.msrb.mxu1 %v561_v28 }
 0x6f5   :  { %721 = vmatpush.msra.mxu1 %v2086_v0 }
 0x6fa   :  { %v587_v37 = vpop.permute.xlu0 %586 }
 0x705   :  { %390 = vrot.lane.b32.xlu1 %v2303_v4, %s2238_s22  ;;  %v753_v4 = vpop.permute.xlu0 %752 }
 0x706   :  { %776 = vmatpush.msrb.mxu0 %v753_v4  ;;  %v41_v4 = vld [vmem:[%s2823_s3 + $0x28] sm:$0xff] }
 0x71e   :  { %v529_v29 = vpop.xlane.xlu1 %528 }
 0x71f   :  { %2145 = vrcp.f32 %v529_v29 }
 0x720   :  { %2147 = vrcp.f32 %v692_v22  ;;  %v33_v22 = vld [vmem:[%s2822_s2 + $0x28] sm:$0xff] }
 0x725   :  { %v2146_v30 = vpop.eup %2145 }
 0x726   :  { %v533_v31 = vmul.f32 %v2146_v30, %v2142_v20  ;;  %v2148_v33 = vpop.eup %2147 }
 0x727   :  { %v698_v5 = vmul.f32 %v2148_v33, %v2140_v63 }
 0x728   :  { %1988 = vmatmul.msk.f32.vlgmr.msrb.gmra.mxu1 %vm134_vm1, %v533_v31  ;;  %v2105_v31 = vld [vmem:[%s2825_s5 + $0x3] ss:$0 sm:$0xff] }
 0x729   :  { %867 = vmatpush.msrb.mxu1 %v35_v21 }
 0x72b   :  { %868 = vmatpush.msrb.mxu1 %v33_v22 }
 0x72d   :  { %869 = vmatpush.msrb.mxu1 %v31_v23 }
 0x72f   :  { %870 = vmatpush.msrb.mxu1 %v29_v24 }
 0x730   :  { %1995 = vmatmul.msk.f32.vlgmr.msra.gmra.mxu1 %vm134_vm1, %v698_v5 }
 0x75f   :  { %v695_v34 = vpop.xlane.xlu1 %694 }
 0x760   :  { %2149 = vrcp.f32 %v695_v34  ;;  %v2106_v34 = vld [vmem:[%s2825_s5 + $0x4] ss:$0 sm:$0xff] }
 0x761   :  { %2151 = vrcp.f32 %v2240_v60 }
 0x766   :  { %v2150_v35 = vpop.eup %2149 }
 0x767   :  { %v699_v36 = vmul.f32 %v2150_v35, %v2144_v1  ;;  %v2152_v61 = vpop.eup %2151 }
 0x768   :  { %v798_v62 = vmul.f32 32.0, %v2152_v61  ;;  %vm802_vm2 = vweird.f32 %v2152_v61 }
 0x769   :  { %1996 = vmatmul.msk.f32.vlgmr.msra.gmra.mxu3 %vm134_vm1, %v699_v36 }
 0x777   :  { %v391_v14 = vpop.permute.xlu1 %390 }
 0x778   :  { %414 = vmatpush.msra.mxu2 %v391_v14  ;;  %v43_v14 = vld [vmem:[%s2823_s3 + $0x38] sm:$0xff] }
 0x779   :  { %1979 = vmatmul.msk.f32.vlgmr.msra.gmra.mxu2 %vm134_vm1, %v2399_v19 }
 0x77a   :  { %610 = vmatpush.msrb.mxu2 %v587_v37  ;;  %v42_v37 = vld [vmem:[%s2823_s3 + $0x30] sm:$0xff] }
 0x77c   :  { %896 = vmatpush.msra.mxu2 %v43_v14 }
 0x77e   :  { %897 = vmatpush.msra.mxu2 %v42_v37  ;;  %v2109_v37 = vld [vmem:[%s2825_s5 + $0x6] ss:$0 sm:$0xff] }
 0x780   :  { %898 = vmatpush.msra.mxu2 %v41_v4 }
 0x781   :  { %1980 = vmatmul.msk.f32.gmra.mxu2 %vm134_vm1, %v2439_v56 }
 0x789   :  { %1989 = vmatmul.msk.f32.vlgmr.msrb.gmra.mxu2 %vm134_vm1, %v557_v10 }
 0x7a5   :  { %v583_v38 = vpop.f32.mrf.mxu1 }
 0x7a6   :  { %1990 = vmatmul.msk.f32.gmra.mxu2 %vm134_vm1, %v583_v38 }
 0x7ad   :  { %v723_v39 = vpop.f32.mrf.mxu1 }
 0x7ae   :  { %1997 = vmatmul.msk.f32.vlgmr.msrb.gmra.mxu0 %vm134_vm1, %v723_v39 }
 0x7ec   :  { %v749_v40 = vpop.f32.mrf.mxu3 }
 0x7ed   :  { %1998 = vmatmul.msk.f32.gmra.mxu0 %vm134_vm1, %v749_v40  ;;  %v40_v40 = vld [vmem:[%s2823_s3 + $0x20] sm:$0xff] }
 0x7ee   :  { %899 = vmatpush.msra.mxu2 %v40_v40 }
 0x7fc   :  { %v416_v41 = vpop.f32.mrf.mxu2 }
 0x7fd   :  { %v449_v43 = vadd.f32 %v2431_v46, %v416_v41 }
 0x804   :  { %v419_v42 = vpop.f32.mrf.mxu2 }
 0x805   :  { %v452_v54 = vadd.f32 %v2433_v47, %v419_v42  ;;  %v39_v42 = vld [vmem:[%s2823_s3 + $0x18] sm:$0xff] }
 0x806   :  { %900 = vmatpush.msra.mxu2 %v39_v42 }
 0x80c   :  { %v612_v19 = vpop.f32.mrf.mxu2 }
 0x80d   :  { %v618_v44 = vadd.f32 %v612_v19, %v449_v43 }
 0x829   :  { %v615_v53 = vpop.f32.mrf.mxu2 }
 0x82a   :  { %v619_v55 = vadd.f32 %v615_v53, %v452_v54  ;;  %v38_v54 = vld [vmem:[%s2823_s3 + $0x10] sm:$0xff] }
 0x82b   :  { %v778_v49 = vpop.f32.mrf.mxu0  ;;  %901 = vmatpush.msra.mxu2 %v38_v54 }
 0x82c   :  { %v784_v50 = vadd.f32 %v778_v49, %v618_v44 }
 0x82e   :  { %v787_v51 = vadd.f32 %v2104_v45, %v784_v50 }
 0x830   :  { %v789_v17 = vadd.f32 %v787_v51, %v2293_v2  ;;  %v799_v2 = vsub.f32 1.0, %v798_v62 }
 0x832   :  { %v791_v52 = vsel %vm55_vm0, %v789_v17, 0.0  ;;  %v800_v63 = vmul.f32 %v2152_v61, %v799_v2  ;;  %v2107_v2 = vld [vmem:[%s2825_s5 + $0x2] ss:$0 sm:$0xff] }
 0x833   :  { %792 = vadd.xlane.f32.xlu2 %v791_v52 }
 0x834   :  { %v801_v6 = vadd.f32 %v2152_v61, %v800_v63 }
 0x836   :  { %v2477_v9 = vsel %vm802_vm2, %v2152_v61, %v801_v6 }
 0x86a   :  { %v781_v56 = vpop.f32.mrf.mxu0 }
 0x86b   :  { %v785_v57 = vadd.f32 %v781_v56, %v619_v55  ;;  %v37_v55 = vld [vmem:[%s2823_s3 + $0x8] sm:$0xff]  ;;  %v36_v56 = vld [vmem:[%s2823_s3] sm:$0xff] }
 0x86c   :  { %902 = vmatpush.msra.mxu2 %v37_v55  ;;  %v2586_v55 = vld [vmem:[%s2824_s4 + $0x2] sm:$0x3] }
 0x86d   :  { %v788_v46 = vadd.f32 %v2104_v45, %v785_v57  ;;  %v848_v57 = vperm.slane %v2335_v11, 1 }
 0x86e   :  { %903 = vmatpush.msra.mxu2 %v36_v56  ;;  %v992_v56 = vperm.slane %v2586_v55, 0 }
 0x86f   :  { %v790_v58 = vadd.f32 %v788_v46, %v2319_v7 }
 0x871   :  { %v794_v59 = vsel %vm55_vm0, %v790_v58, 0.0 }
 0x872   :  { %795 = vadd.xlane.f32.xlu1 %v794_v59 }
 0x8a6   :  { %v793_v47 = vpop.xlane.xlu2 %792 }
 0x8a7   :  { %v804_v10 = vmul.f32 %v2477_v9, %v793_v47 }
 0x8a9   :  { %v806_v12 = vsub.f32 %v789_v17, %v804_v10 }
 0x8ab   :  { %v808_v13 = vmul.f32 %v806_v12, %v806_v12 }
 0x8ad   :  { %v810_v7 = vsel %vm55_vm0, %v808_v13, 0.0 }
 0x8ae   :  { %811 = vadd.xlane.f32.xlu0 %v810_v7 }
 0x8e5   :  { %v796_v15 = vpop.xlane.xlu1 %795 }
 0x8e6   :  { %v805_v16 = vmul.f32 %v2477_v9, %v796_v15 }
 0x8e8   :  { %v807_v18 = vsub.f32 %v790_v58, %v805_v16 }
 0x8ea   :  { %v809_v32 = vmul.f32 %v807_v18, %v807_v18 }
 0x8ec   :  { %v813_v20 = vsel %vm55_vm0, %v809_v32, 0.0 }
 0x8ed   :  { %814 = vadd.xlane.f32.xlu2 %v813_v20 }
 0x921   :  { %v812_v25 = vpop.xlane.xlu0 %811 }
 0x922   :  { %v816_v48 = vmul.f32 %v812_v25, %v2477_v9 }
 0x924   :  { %v818_v26 = vadd.f32 1e-05, %v816_v48  ;;  %v2544_v48 = vld [vmem:[%s2822_s2 + $0x70] sm:$0xff] }
 0x925   :  { %1011 = vmatpush.msrb.mxu3 %v2544_v48 }
 0x926   :  { %2153 = vrsqrt.f32 %v818_v26  ;;  %vm826_vm4 = vweird.f32 %v818_v26 }
 0x92c   :  { %v2154_v1 = vpop.eup %2153 }
 0x92d   :  { %v821_v27 = vmul.f32 %v2154_v1, %v818_v26  ;;  %vm827_vm3 = vweird.f32 %v2154_v1  ;;  %v2550_v26 = vld [vmem:[%s2822_s2 + $0x60] sm:$0xff] }
 0x92e   :  { %vm828_vm5 = vmor %vm826_vm4, %vm827_vm3  ;;  %1012 = vmatpush.msrb.mxu3 %v2550_v26 }
 0x92f   :  { %v822_v0 = vmul.f32 %v2154_v1, %v821_v27  ;;  %v2561_v27 = vld [vmem:[%s2822_s2 + $0x40] sm:$0xff] }
 0x931   :  { %v823_v28 = vmul.f32 0.5, %v822_v0 }
 0x933   :  { %v824_v29 = vsub.f32 1.5, %v823_v28 }
 0x935   :  { %v825_v30 = vmul.f32 %v2154_v1, %v824_v29 }
 0x937   :  { %v829_v33 = vsel %vm828_vm5, %v2154_v1, %v825_v30  ;;  %v2556_v1 = vld [vmem:[%s2822_s2 + $0x50] sm:$0xff] }
 0x938   :  { %v840_v5 = vmul.f32 %v829_v33, %v806_v12  ;;  %1013 = vmatpush.msrb.mxu3 %v2556_v1 }
 0x93a   :  { %v843_v35 = vmul.f32 %v2105_v31, %v840_v5  ;;  %1014 = vmatpush.msrb.mxu3 %v2561_v27 }
 0x93c   :  { %v846_v36 = vadd.f32 %v2106_v34, %v843_v35 }
 0x93e   :  { %1999 = vmatmul.msk.f32.vlgmr.msrb.gmra.mxu1 %vm55_vm0, %v846_v36 }
 0x960   :  { %v815_v38 = vpop.xlane.xlu2 %814 }
 0x961   :  { %v817_v39 = vmul.f32 %v815_v38, %v2477_v9 }
 0x963   :  { %v819_v41 = vadd.f32 1e-05, %v817_v39 }
 0x965   :  { %2155 = vrsqrt.f32 %v819_v41  ;;  %vm836_vm7 = vweird.f32 %v819_v41 }
 0x96b   :  { %v2156_v19 = vpop.eup %2155 }
 0x96c   :  { %v831_v43 = vmul.f32 %v2156_v19, %v819_v41  ;;  %vm837_vm6 = vweird.f32 %v2156_v19 }
 0x96d   :  { %vm838_vm8 = vmor %vm836_vm7, %vm837_vm6 }
 0x96e   :  { %v832_v44 = vmul.f32 %v2156_v19, %v831_v43 }
 0x970   :  { %v833_v45 = vmul.f32 0.5, %v832_v44 }
 0x972   :  { %v834_v49 = vsub.f32 1.5, %v833_v45 }
 0x974   :  { %v835_v50 = vmul.f32 %v2156_v19, %v834_v49 }
 0x976   :  { %v839_v51 = vsel %vm838_vm8, %v2156_v19, %v835_v50 }
 0x977   :  { %v841_v17 = vmul.f32 %v839_v51, %v807_v18 }
 0x979   :  { %v844_v52 = vmul.f32 %v2105_v31, %v841_v17 }
 0x97b   :  { %v847_v53 = vadd.f32 %v2106_v34, %v844_v52 }
 0x97d   :  { %2000 = vmatmul.msk.f32.gmra.mxu1 %vm55_vm0, %v847_v53 }
 0x9bb   :  { %v872_v46 = vpop.f32.mrf.mxu1 }
 0x9bc   :  { %v873_v58 = vadd.f32 %v872_v46, %v848_v57 }
 0x9be   :  { %v878_v59 = vmax.f32 %v873_v58, 0.0 }
 0x9c0   :  { %2001 = vmatmul.msk.f32.vlgmr.msra.gmra.mxu2 %vm881_vm9, %v878_v59 }
 0x9fa   :  { %v875_v60 = vpop.f32.mrf.mxu1 }
 0x9fb   :  { %v876_v61 = vadd.f32 %v875_v60, %v848_v57  ;;  %v2088_v60 = vpack.i.bf16 %v2550_v26, %v2544_v48 }
 0x9fd   :  { %v879_v62 = vmax.f32 %v876_v61, 0.0 }
 0x9ff   :  { %2002 = vmatmul.msk.f32.gmra.mxu2 %vm881_vm9, %v879_v62 }
 0xa43   :  { %v905_v63 = vpop.f32.mrf.mxu2 }
 0xa44   :  { %v906_v6 = vadd.f32 %v2107_v2, %v905_v63 }
 0xa46   :  { %v911_v47 = vadd.f32 %v906_v6, %v846_v36  ;;  %v2108_v36 = vld [vmem:[%s2825_s5 + $0x5] ss:$0 sm:$0xff] }
 0xa48   :  { %v913_v11 = vsel %vm55_vm0, %v911_v47, 0.0 }
 0xa49   :  { %914 = vadd.xlane.f32.xlu1 %v913_v11 }
 0xa82   :  { %v908_v10 = vpop.f32.mrf.mxu2 }
 0xa83   :  { %v909_v12 = vadd.f32 %v2107_v2, %v908_v10 }
 0xa85   :  { %v912_v13 = vadd.f32 %v909_v12, %v847_v53 }
 0xa87   :  { %v916_v7 = vsel %vm55_vm0, %v912_v13, 0.0 }
 0xa88   :  { %917 = vadd.xlane.f32.xlu0 %v916_v7 }
 0xabc   :  { %v915_v15 = vpop.xlane.xlu1 %914 }
 0xabd   :  { %v919_v16 = vmul.f32 %v915_v15, %v2477_v9 }
 0xabf   :  { %v921_v18 = vsub.f32 %v911_v47, %v919_v16 }
 0xac1   :  { %v923_v32 = vmul.f32 %v921_v18, %v921_v18 }
 0xac3   :  { %v925_v20 = vsel %vm55_vm0, %v923_v32, 0.0  ;;  %v2110_v32 = vld [vmem:[%s2825_s5 + $0x7] ss:$0 sm:$0xff] }
 0xac4   :  { %926 = vadd.xlane.f32.xlu2 %v925_v20 }
 0xafb   :  { %v918_v21 = vpop.xlane.xlu0 %917 }
 0xafc   :  { %v920_v22 = vmul.f32 %v918_v21, %v2477_v9 }
 0xafe   :  { %v922_v23 = vsub.f32 %v912_v13, %v920_v22 }
 0xb00   :  { %v924_v24 = vmul.f32 %v922_v23, %v922_v23 }
 0xb02   :  { %v928_v25 = vsel %vm55_vm0, %v924_v24, 0.0 }
 0xb03   :  { %929 = vadd.xlane.f32.xlu1 %v928_v25 }
 0xb37   :  { %v927_v0 = vpop.xlane.xlu2 %926 }
 0xb38   :  { %v931_v28 = vmul.f32 %v927_v0, %v2477_v9 }
 0xb3a   :  { %v933_v29 = vadd.f32 1e-05, %v931_v28 }
 0xb3c   :  { %2157 = vrsqrt.f32 %v933_v29  ;;  %vm941_vm11 = vweird.f32 %v933_v29 }
 0xb42   :  { %v2158_v30 = vpop.eup %2157 }
 0xb43   :  { %v936_v31 = vmul.f32 %v2158_v30, %v933_v29  ;;  %vm942_vm10 = vweird.f32 %v2158_v30 }
 0xb44   :  { %vm943_vm12 = vmor %vm941_vm11, %vm942_vm10 }
 0xb45   :  { %v937_v33 = vmul.f32 %v2158_v30, %v936_v31 }
 0xb47   :  { %v938_v5 = vmul.f32 0.5, %v937_v33 }
 0xb49   :  { %v939_v34 = vsub.f32 1.5, %v938_v5 }
 0xb4b   :  { %v940_v35 = vmul.f32 %v2158_v30, %v939_v34 }
 0xb4d   :  { %v944_v14 = vsel %vm943_vm12, %v2158_v30, %v940_v35 }
 0xb4e   :  { %v955_v4 = vmul.f32 %v944_v14, %v921_v18 }
 0xb50   :  { %v958_v38 = vmul.f32 %v2108_v36, %v955_v4 }
 0xb52   :  { %v2572_v39 = vadd.f32 %v2109_v37, %v958_v38 }
 0xb54   :  { %v990_v40 = vadd.f32 %v2572_v39, %v2298_v3 }
 0xb56   :  { %2020 = vmatmul.msk.f32.vlgmr.msrb.gmra.mxu3 %vm55_vm0, %v990_v40 }
 0xb76   :  { %v930_v41 = vpop.xlane.xlu1 %929 }
 0xb77   :  { %v932_v42 = vmul.f32 %v930_v41, %v2477_v9 }
 0xb79   :  { %v934_v19 = vadd.f32 1e-05, %v932_v42 }
 0xb7b   :  { %2159 = vrsqrt.f32 %v934_v19  ;;  %vm951_vm14 = vweird.f32 %v934_v19 }
 0xb81   :  { %v2160_v43 = vpop.eup %2159 }
 0xb82   :  { %v946_v44 = vmul.f32 %v2160_v43, %v934_v19  ;;  %vm952_vm13 = vweird.f32 %v2160_v43 }
 0xb83   :  { %vm953_vm15 = vmor %vm951_vm14, %vm952_vm13 }
 0xb84   :  { %v947_v45 = vmul.f32 %v2160_v43, %v946_v44 }
 0xb86   :  { %v948_v49 = vmul.f32 0.5, %v947_v45 }
 0xb88   :  { %v949_v50 = vsub.f32 1.5, %v948_v49 }
 0xb8a   :  { %v950_v51 = vmul.f32 %v2160_v43, %v949_v50 }
 0xb8c   :  { %v954_v17 = vsel %vm953_vm15, %v2160_v43, %v950_v51 }
 0xb8d   :  { %v956_v52 = vmul.f32 %v954_v17, %v922_v23 }
 0xb8f   :  { %v959_v53 = vmul.f32 %v2108_v36, %v956_v52 }
 0xb91   :  { %v2578_v3 = vadd.f32 %v2109_v37, %v959_v53 }
 0xb93   :  { %v991_v54 = vadd.f32 %v2578_v3, %v2324_v8  ;;  %v2093_v8 = vpack.i.bf16 %v2561_v27, %v2556_v1 }
 0xb95   :  { %2021 = vmatmul.msk.f32.gmra.mxu3 %vm55_vm0, %v991_v54 }
 0xbd9   :  { %v1016_v57 = vpop.f32.mrf.mxu3 }
 0xbda   :  { %v2589_v46 = vadd.f32 %v1016_v57, %v992_v56 }
 0xbdc   :  { %1194 = vrot.lane.b32.xlu1 %v2589_v46, %s2233_s15  ;;  %1069 = vrot.lane.b32.xlu0 %v2589_v46, %s2232_s1 }
 0xbe4   :  { %1192 = vrot.lane.b32.xlu0 %v2589_v46, %s2234_s16 }
 0xbec   :  { %2094 = vrot.lane.b32.xlu0 %v2093_v8, %s2231_s13 }
 0xc18   :  { %v1019_v58 = vpop.f32.mrf.mxu3 }
 0xc19   :  { %v2600_v59 = vadd.f32 %v1019_v58, %v992_v56 }
 0xc1b   :  { %1096 = vrot.lane.b32.xlu2 %v2600_v59, %s2232_s1 }
 0xc23   :  { %2089 = vrot.lane.b32.xlu2 %v2088_v60, %s2231_s13 }
 0xc4e   :  { %v1070_v61 = vpop.permute.xlu0 %1069  ;;  %v1195_v63 = vpop.permute.xlu1 %1194 }
 0xc4f   :  { %2024 = vmatpush.xpose.msk.msra.mxu1 %vm134_vm1, %v1070_v61 }
 0xc52   :  { %2025 = vmatmul.msk.f32.vlgmr.msra.gmra.mxu1 %vm134_vm1, %v2589_v46 }
 0xc56   :  { %v1193_v62 = vpop.permute.xlu0 %1192 }
 0xc5e   :  { %v2095_v47 = vpop.permute.xlu0 %2094 }
 0xc5f   :  { %v2096_v12 = vunpack.i.l.bf16 %v2095_v47  ;;  %v2097_v13 = vunpack.i.h.bf16 %v2095_v47 }
 0xc75   :  { %v1097_v2 = vpop.permute.xlu2 %1096 }
 0xc76   :  { %2026 = vmatpush.xpose.msk.msrb.mxu2 %vm134_vm1, %v1097_v2 }
 0xc79   :  { %2027 = vmatmul.msk.f32.vlgmr.msrb.gmra.mxu2 %vm134_vm1, %v2600_v59 }
 0xc7a   :  { %2030 = vmatpush.xpose.msk.msra.mxu2 %vm134_vm1, %v1195_v63 }
 0xc7d   :  { %v2090_v6 = vpop.permute.xlu2 %2089 }
 0xc7e   :  { %v2092_v11 = vunpack.i.h.bf16 %v2090_v6  ;;  %v2091_v10 = vunpack.i.l.bf16 %v2090_v6 }
 0xc80   :  { %1057 = vmatpush.msra.mxu0 %v2091_v10 }
 0xc81   :  { %2031 = vmatmul.msk.f32.vlgmr.msra.gmra.mxu2 %vm134_vm1, %v1193_v62 }
 0xc82   :  { %1058 = vmatpush.msra.mxu0 %v2092_v11 }
 0xc84   :  { %1059 = vmatpush.msra.mxu0 %v2096_v12 }
 0xc86   :  { %1060 = vmatpush.msra.mxu0 %v2097_v13 }
 0xc87   :  { %2022 = vmatmul.msk.f32.vlgmr.msra.gmra.mxu0 %vm55_vm0, %v2572_v39 }
 0xc8f   :  { %2023 = vmatmul.msk.f32.gmra.mxu0 %vm55_vm0, %v2578_v3 }
 0xccf   :  { %v1092_v7 = vpop.f32.mrf.mxu1 }
 0xcd0   :  { %v1122_v15 = vmul.f32 0.35355338, %v1092_v7 }
 0xcd2   :  { %v1124_v16 = vsel %vm134_vm1, %v1122_v15, -inf }
 0xcd3   :  { %1125 = vmax.xlane.f32.xlu1 %v1124_v16 }
 0xcfc   :  { %v1119_v18 = vpop.f32.mrf.mxu2 }
 0xcfd   :  { %v1123_v31 = vmul.f32 0.35355338, %v1119_v18 }
 0xcff   :  { %v1127_v33 = vsel %vm134_vm1, %v1123_v31, -inf }
 0xd04   :  { %v1062_v20 = vpop.f32.mrf.mxu0  ;;  %v1217_v21 = vpop.f32.mrf.mxu2 }
 0xd05   :  { %v2623_v22 = vadd.f32 %v2110_v32, %v1062_v20  ;;  %v1248_v23 = vmul.f32 0.35355338, %v1217_v21 }
 0xd07   :  { %1164 = vmatpush.msra.mxu3 %v2623_v22  ;;  %v1250_v24 = vsel %vm134_vm1, %v1248_v23, -inf }
 0xd08   :  { %1251 = vmax.xlane.f32.xlu2 %v1250_v24 }
 0xd0c   :  { %v1065_v25 = vpop.f32.mrf.mxu0 }
 0xd0d   :  { %v2627_v0 = vadd.f32 %v2110_v32, %v1065_v25 }
 0xd0f   :  { %1187 = vmatpush.msrb.mxu1 %v2627_v0 }
 0xd20   :  { %1222 = vrot.lane.b32.xlu2 %v2600_v59, %s2233_s15 }
 0xd28   :  { %1392 = vrot.lane.b32.xlu2 %v2589_v46, %s2235_s19 }
 0xd46   :  { %v1126_v28 = vpop.xlane.xlu1 %1125 }
 0xd47   :  { %v1130_v29 = vsub.f32 %v1122_v15, %v1126_v28 }
 0xd49   :  { %v1132_v30 = vmul.f32 1.442695, %v1130_v29 }
 0xd4b   :  { %2161 = vpow2.f32 %v1132_v30 }
 0xd51   :  { %v2162_v5 = vpop.eup %2161  ;;  %1128 = vmax.xlane.f32.xlu2 %v1127_v33 }
 0xd52   :  { %v1136_v34 = vsel %vm134_vm1, %v2162_v5, 0.0 }
 0xd53   :  { %1137 = vadd.xlane.f32.xlu0 %v1136_v34 }
 0xd67   :  { %1220 = vrot.lane.b32.xlu0 %v2600_v59, %s2234_s16 }
 0xd6f   :  { %1390 = vrot.lane.b32.xlu0 %v2589_v46, %s2236_s20 }
 0xd7b   :  { %v1252_v35 = vpop.xlane.xlu2 %1251 }
 0xd7c   :  { %v1256_v36 = vsub.f32 %v1248_v23, %v1252_v35 }
 0xd7e   :  { %v1258_v14 = vmul.f32 1.442695, %v1256_v36 }
 0xd80   :  { %2163 = vpow2.f32 %v1258_v14 }
 0xd83   :  { %v1223_v37 = vpop.permute.xlu2 %1222 }
 0xd84   :  { %2032 = vmatpush.xpose.msk.msrb.mxu3 %vm134_vm1, %v1223_v37 }
 0xd86   :  { %v2164_v4 = vpop.eup %2163 }
 0xd87   :  { %v1262_v38 = vsel %vm134_vm1, %v2164_v4, 0.0 }
 0xd88   :  { %1263 = vadd.xlane.f32.xlu1 %v1262_v38 }
 0xd8b   :  { %v1393_v40 = vpop.permute.xlu2 %1392 }
 0xda1   :  { %1273 = vrot.lane.b32.xlu1 %v2623_v22, %s2234_s16 }
 0xdc4   :  { %v1129_v41 = vpop.xlane.xlu2 %1128 }
 0xdc5   :  { %v1131_v42 = vsub.f32 %v1123_v31, %v1129_v41 }
 0xdc6   :  { %v1138_v19 = vpop.xlane.xlu0 %1137 }
 0xdc7   :  { %v1134_v43 = vmul.f32 1.442695, %v1131_v42  ;;  %2165 = vrcp.f32 %v1138_v19 }
 0xdc9   :  { %2167 = vpow2.f32 %v1134_v43 }
 0xdcd   :  { %v2166_v44 = vpop.eup %2165 }
 0xdce   :  { %v1144_v45 = vmul.f32 %v2166_v44, %v2162_v5 }
 0xdcf   :  { %v2168_v49 = vpop.eup %2167 }
 0xdd0   :  { %2028 = vmatmul.msk.f32.vlgmr.msra.gmra.mxu3 %vm134_vm1, %v1144_v45  ;;  %v1139_v50 = vsel %vm134_vm1, %v2168_v49, 0.0 }
 0xdd1   :  { %1140 = vadd.xlane.f32.xlu0 %v1139_v50 }
 0xdd9   :  { %v1221_v51 = vpop.permute.xlu0 %1220 }
 0xdda   :  { %2033 = vmatmul.msk.f32.vlgmr.msrb.gmra.mxu3 %vm134_vm1, %v1221_v51 }
 0xde1   :  { %v1391_v56 = vpop.permute.xlu0 %1390 }
 0xdfb   :  { %v1264_v17 = vpop.xlane.xlu1 %1263 }
 0xdfc   :  { %2169 = vrcp.f32 %v1264_v17 }
 0xe02   :  { %v2170_v52 = vpop.eup %2169 }
 0xe03   :  { %v1270_v53 = vmul.f32 %v2170_v52, %v2164_v4 }
 0xe13   :  { %v1274_v54 = vpop.permute.xlu1 %1273 }
 0xe14   :  { %1294 = vmatpush.msrb.mxu0 %v1274_v54 }
 0xe15   :  { %2034 = vmatmul.msk.f32.vlgmr.msrb.gmra.mxu0 %vm134_vm1, %v1270_v53 }
 0xe16   :  { %2040 = vmatpush.xpose.msk.msra.mxu0 %vm134_vm1, %v1393_v40 }
 0xe1d   :  { %2041 = vmatmul.msk.f32.vlgmr.msra.gmra.mxu0 %vm134_vm1, %v1391_v56 }
 0xe44   :  { %v1141_v57 = vpop.xlane.xlu0 %1140 }
 0xe45   :  { %2171 = vrcp.f32 %v1141_v57 }
 0xe4b   :  { %v2172_v8 = vpop.eup %2171 }
 0xe4c   :  { %v1145_v58 = vmul.f32 %v2172_v8, %v2168_v49 }
 0xe4e   :  { %2029 = vmatmul.msk.f32.vlgmr.msrb.gmra.mxu1 %vm134_vm1, %v1145_v58 }
 0xe53   :  { %v1166_v60 = vpop.f32.mrf.mxu3 }
 0xe5d   :  { %v1245_v61 = vpop.f32.mrf.mxu3 }
 0xe5e   :  { %v1249_v62 = vmul.f32 0.35355338, %v1245_v61 }
 0xe60   :  { %v1253_v2 = vsel %vm134_vm1, %v1249_v62, -inf }
 0xe61   :  { %1254 = vmax.xlane.f32.xlu1 %v1253_v2 }
 0xe7a   :  { %1358 = vrot.lane.b32.xlu1 %v2561_v27, %s2238_s22 }
 0xe82   :  { %1558 = vrot.lane.b32.xlu1 %v2589_v46, %s2237_s21 }
 0xe8a   :  { %1470 = vrot.lane.b32.xlu1 %v2623_v22, %s2236_s20 }
 0xe92   :  { %1584 = vrot.lane.b32.xlu1 %v2600_v59, %s2239_s23  ;;  %v2660_v63 = vpop.f32.mrf.mxu0 }
 0xe9a   :  { %v1415_v6 = vpop.f32.mrf.mxu0 }
 0xe9b   :  { %v1446_v47 = vmul.f32 0.35355338, %v1415_v6 }
 0xe9d   :  { %v1448_v11 = vsel %vm134_vm1, %v1446_v47, -inf }
 0xe9e   :  { %1449 = vmax.xlane.f32.xlu2 %v1448_v11 }
 0xeb6   :  { %1300 = vrot.lane.b32.xlu2 %v2627_v0, %s2234_s16 }
 0xebe   :  { %1418 = vrot.lane.b32.xlu2 %v2600_v59, %s2236_s20 }
 0xec6   :  { %1586 = vrot.lane.b32.xlu2 %v2600_v59, %s2237_s21 }
 0xecb   :  { %v1189_v18 = vpop.f32.mrf.mxu1 }
 0xed4   :  { %v1255_v27 = vpop.xlane.xlu1 %1254 }
 0xed5   :  { %v1257_v10 = vsub.f32 %v1249_v62, %v1255_v27  ;;  %v2098_v27 = vpack.i.bf16 %v2627_v0, %v2623_v22 }
 0xed7   :  { %v1260_v12 = vmul.f32 1.442695, %v1257_v10 }
 0xed9   :  { %2173 = vpow2.f32 %v1260_v12 }
 0xedf   :  { %v2174_v13 = vpop.eup %2173 }
 0xee0   :  { %v1265_v7 = vsel %vm134_vm1, %v2174_v13, 0.0 }
 0xee1   :  { %1266 = vadd.xlane.f32.xlu0 %v1265_v7 }
 0xeec   :  { %v1359_v15 = vpop.permute.xlu1 %1358 }
 0xeed   :  { %1382 = vmatpush.msra.mxu3 %v1359_v15 }
 0xeee   :  { %2038 = vmatmul.msk.f32.vlgmr.msra.gmra.mxu3 %vm134_vm1, %v1166_v60 }
 0xef4   :  { %v1559_v16 = vpop.permute.xlu1 %1558 }
 0xef5   :  { %1420 = vrot.lane.b32.xlu0 %v2600_v59, %s2235_s19  ;;  %2048 = vmatpush.xpose.msk.msrb.mxu3 %vm134_vm1, %v1559_v16 }
 0xef6   :  { %2039 = vmatmul.msk.f32.gmra.mxu3 %vm134_vm1, %v1189_v18 }
 0xefc   :  { %v1471_v32 = vpop.permute.xlu1 %1470 }
 0xefd   :  { %1491 = vmatpush.msrb.mxu0 %v1471_v32 }
 0xf04   :  { %v1585_v14 = vpop.permute.xlu1 %1584 }
 0xf11   :  { %v1450_v20 = vpop.xlane.xlu2 %1449 }
 0xf12   :  { %v1454_v21 = vsub.f32 %v1446_v47, %v1450_v20 }
 0xf14   :  { %v1456_v23 = vmul.f32 1.442695, %v1454_v21 }
 0xf16   :  { %2175 = vpow2.f32 %v1456_v23 }
 0xf19   :  { %v1301_v24 = vpop.permute.xlu2 %1300 }
 0xf1a   :  { %1321 = vmatpush.msra.mxu1 %v1301_v24 }
 0xf1c   :  { %v2176_v25 = vpop.eup %2175 }
 0xf1d   :  { %v1460_v28 = vsel %vm134_vm1, %v2176_v25, 0.0 }
 0xf1f   :  { %1461 = vadd.xlane.f32.xlu0 %v1460_v28 }
 0xf21   :  { %v1419_v29 = vpop.permute.xlu2 %1418 }
 0xf29   :  { %v1587_v30 = vpop.permute.xlu2 %1586 }
 0xf2a   :  { %2050 = vmatpush.xpose.msk.msra.mxu0 %vm134_vm1, %v1587_v30 }
 0xf33   :  { %1556 = vrot.lane.b32.xlu0 %v2589_v46, %s2239_s23 }
 0xf54   :  { %v1267_v59 = vpop.xlane.xlu0 %1266 }
 0xf55   :  { %2177 = vrcp.f32 %v1267_v59 }
 0xf5b   :  { %v2178_v31 = vpop.eup %2177 }
 0xf5c   :  { %v1271_v33 = vmul.f32 %v2178_v31, %v2174_v13 }
 0xf5e   :  { %2035 = vmatmul.msk.f32.vlgmr.msra.gmra.mxu1 %vm134_vm1, %v1271_v33  ;;  %v2111_v33 = vld [vmem:[%s2825_s5 + $0x8] ss:$0 sm:$0xff] }
 0xf67   :  { %v1421_v5 = vpop.permute.xlu0 %1420 }
 0xf68   :  { %2042 = vmatpush.xpose.msk.msrb.mxu1 %vm134_vm1, %v1421_v5 }
 0xf6b   :  { %2043 = vmatmul.msk.f32.vlgmr.msrb.gmra.mxu1 %vm134_vm1, %v1419_v29 }
 0xf71   :  { %v2688_v41 = vpop.f32.mrf.mxu3 }
 0xf79   :  { %v2692_v19 = vpop.f32.mrf.mxu3 }
 0xf92   :  { %v1462_v34 = vpop.xlane.xlu0 %1461 }
 0xf93   :  { %2179 = vrcp.f32 %v1462_v34 }
 0xf99   :  { %v2180_v35 = vpop.eup %2179 }
 0xf9a   :  { %v1468_v36 = vmul.f32 %v2180_v35, %v2176_v25 }
 0xf9c   :  { %2044 = vmatmul.msk.f32.vlgmr.msrb.gmra.mxu0 %vm134_vm1, %v1468_v36 }
 0xfa4   :  { %2051 = vmatmul.msk.f32.vlgmr.msra.gmra.mxu0 %vm134_vm1, %v1585_v14 }
 0xfa5   :  { %v1557_v46 = vpop.permute.xlu0 %1556 }
 0xfa6   :  { %2049 = vmatmul.msk.f32.vlgmr.msrb.gmra.mxu3 %vm134_vm1, %v1557_v46 }
 0xfdb   :  { %v2685_v37 = vpop.f32.mrf.mxu1 }
 0xfe8   :  { %v1443_v4 = vpop.f32.mrf.mxu1 }
 0xfe9   :  { %v1447_v38 = vmul.f32 0.35355338, %v1443_v4 }
 0xfeb   :  { %v1451_v40 = vsel %vm134_vm1, %v1447_v38, -inf }
 0xfec   :  { %1452 = vmax.xlane.f32.xlu0 %v1451_v40 }
0x1019   :  { %v2690_v42 = vpop.f32.mrf.mxu0 }
0x1021   :  { %v1609_v43 = vpop.f32.mrf.mxu0 }
0x1022   :  { %v1613_v44 = vmul.f32 0.35355338, %v1609_v43 }
0x1024   :  { %v1617_v45 = vsel %vm134_vm1, %v1613_v44, -inf }
0x1025   :  { %1618 = vmax.xlane.f32.xlu1 %v1617_v45 }
0x1029   :  { %v1581_v49 = vpop.f32.mrf.mxu3 }
0x102a   :  { %v1612_v50 = vmul.f32 0.35355338, %v1581_v49 }
0x102c   :  { %v1614_v51 = vsel %vm134_vm1, %v1612_v50, -inf }
0x102d   :  { %1615 = vmax.xlane.f32.xlu2 %v1614_v51 }
0x103e   :  { %1496 = vrot.lane.b32.xlu1 %v2627_v0, %s2236_s20 }
0x1046   :  { %1522 = vrot.lane.b32.xlu1 %v2550_v26, %s2238_s22 }
0x105f   :  { %v1453_v17 = vpop.xlane.xlu0 %1452 }
0x1060   :  { %v1455_v52 = vsub.f32 %v1447_v38, %v1453_v17 }
0x1062   :  { %v1458_v53 = vmul.f32 1.442695, %v1455_v52 }
0x1064   :  { %2181 = vpow2.f32 %v1458_v53 }
0x106a   :  { %v2182_v54 = vpop.eup %2181 }
0x106b   :  { %v1463_v56 = vsel %vm134_vm1, %v2182_v54, 0.0 }
0x106c   :  { %1464 = vadd.xlane.f32.xlu0 %v1463_v56  ;;  %v2006_v56 = vld [vmem:[%s2822_s2 + $0x58] sm:$0xff] }
0x1098   :  { %v1619_v57 = vpop.xlane.xlu1 %1618 }
0x1099   :  { %v1621_v8 = vsub.f32 %v1613_v44, %v1619_v57  ;;  %v2004_v57 = vld [vmem:[%s2822_s2 + $0x48] sm:$0xff] }
0x109b   :  { %v1624_v58 = vmul.f32 1.442695, %v1621_v8 }
0x109d   :  { %2183 = vpow2.f32 %v1624_v58 }
0x10a0   :  { %v1616_v60 = vpop.xlane.xlu2 %1615 }
0x10a1   :  { %v1620_v61 = vsub.f32 %v1612_v50, %v1616_v60 }
0x10a3   :  { %v2184_v62 = vpop.eup %2183  ;;  %v1622_v2 = vmul.f32 1.442695, %v1620_v61  ;;  %v2018_v61 = vld [vmem:[%s2823_s3 + $0x78] sm:$0xff] }
0x10a4   :  { %v1629_v6 = vsel %vm134_vm1, %v2184_v62, 0.0 }
0x10a5   :  { %2185 = vpow2.f32 %v1622_v2  ;;  %1630 = vadd.xlane.f32.xlu0 %v1629_v6  ;;  %v2016_v2 = vld [vmem:[%s2823_s3 + $0x68] sm:$0xff] }
0x10ab   :  { %v2186_v26 = vpop.eup %2185 }
0x10ac   :  { %v1626_v47 = vsel %vm134_vm1, %v2186_v26, 0.0 }
0x10ad   :  { %1627 = vadd.xlane.f32.xlu2 %v1626_v47  ;;  %v2015_v47 = vld [vmem:[%s2823_s3 + $0x60] sm:$0xff] }
0x10b0   :  { %v1497_v11 = vpop.permute.xlu1 %1496 }
0x10b1   :  { %1517 = vmatpush.msra.mxu1 %v1497_v11 }
0x10b9   :  { %1326 = vrot.lane.b32.xlu0 %v2556_v1, %s2238_s22 }
0x10c5   :  { %2099 = vrot.lane.b32.xlu2 %v2098_v27, %s2239_s23 }
0x10cd   :  { %1688 = vrot.lane.b32.xlu2 %v2544_v48, %s2238_s22  ;;  %v1523_v48 = vpop.permute.xlu1 %1522 }
0x10df   :  { %v1465_v10 = vpop.xlane.xlu0 %1464 }
0x10e0   :  { %2187 = vrcp.f32 %v1465_v10  ;;  %v2014_v10 = vld [vmem:[%s2823_s3 + $0x58] sm:$0xff] }
0x10e6   :  { %v2188_v12 = vpop.eup %2187 }
0x10e7   :  { %v1469_v13 = vmul.f32 %v2188_v12, %v2182_v54  ;;  %v2008_v54 = vld [vmem:[%s2822_s2 + $0x68] sm:$0xff] }
0x10e9   :  { %2045 = vmatmul.msk.f32.vlgmr.msra.gmra.mxu1 %vm134_vm1, %v1469_v13 }
0x1118   :  { %v1631_v7 = vpop.xlane.xlu0 %1630 }
0x1120   :  { %v1628_v15 = vpop.xlane.xlu2 %1627 }
0x1121   :  { %2189 = vrcp.f32 %v1628_v15 }
0x1122   :  { %2191 = vrcp.f32 %v1631_v7 }
0x1127   :  { %v2190_v16 = vpop.eup %2189 }
0x1128   :  { %v2192_v1 = vpop.eup %2191  ;;  %v2100_v18 = vpop.permute.xlu2 %2099  ;;  %v1634_v0 = vmul.f32 %v2190_v16, %v2186_v26 }
0x1129   :  { %v2102_v32 = vunpack.i.h.bf16 %v2100_v18  ;;  %v2101_v22 = vunpack.i.l.bf16 %v2100_v18  ;;  %v1635_v20 = vmul.f32 %v2192_v1, %v2184_v62  ;;  %v2017_v62 = vld [vmem:[%s2823_s3 + $0x70] sm:$0xff] }
0x112b   :  { %1683 = vmatpush.msra.mxu3 %v2102_v32  ;;  %v1327_v21 = vpop.permute.xlu0 %1326  ;;  %1657 = vmatpush.msrb.mxu1 %v2101_v22  ;;  %v2112_v32 = vld [vmem:[%s2825_s5 + $0xa] ss:$0 sm:$0xff] }
0x112c   :  { %1350 = vmatpush.msrb.mxu2 %v1327_v21  ;;  %2052 = vmatmul.msk.f32.vlgmr.msrb.gmra.mxu1 %vm134_vm1, %v1634_v0  ;;  %v2113_v21 = vld [vmem:[%s2825_s5 + $0xb] ss:$0 sm:$0xff] }
0x112d   :  { %2053 = vmatmul.msk.f32.vlgmr.msra.gmra.mxu3 %vm134_vm1, %v1635_v20  ;;  %2036 = vmatmul.msk.f32.vlgmr.msrb.gmra.mxu2 %vm134_vm1, %v2660_v63 }
0x112e   :  { %1546 = vmatpush.msra.mxu2 %v1523_v48 }
0x1130   :  { %v1689_v23 = vpop.permute.xlu2 %1688  ;;  %1824 = vmatpush.msrb.mxu2 %v2018_v61 }
0x1131   :  { %1712 = vmatpush.msrb.mxu0 %v1689_v23 }
0x1132   :  { %1825 = vmatpush.msrb.mxu2 %v2017_v62 }
0x1134   :  { %1826 = vmatpush.msrb.mxu2 %v2016_v2 }
0x1135   :  { %2037 = vmatmul.msk.f32.gmra.mxu2 %vm134_vm1, %v2685_v37 }
0x1136   :  { %1827 = vmatpush.msrb.mxu2 %v2015_v47 }
0x1138   :  { %1828 = vmatpush.msrb.mxu2 %v2014_v10 }
0x113d   :  { %2046 = vmatmul.msk.f32.vlgmr.msra.gmra.mxu2 %vm134_vm1, %v2690_v42 }
0x1166   :  { %v1519_v24 = vpop.f32.mrf.mxu1 }
0x1167   :  { %2047 = vmatmul.msk.f32.gmra.mxu2 %vm134_vm1, %v1519_v24 }
0x11a9   :  { %v1659_v25 = vpop.f32.mrf.mxu1 }
0x11aa   :  { %2054 = vmatmul.msk.f32.vlgmr.msrb.gmra.mxu0 %vm134_vm1, %v1659_v25 }
0x11b0   :  { %v1685_v28 = vpop.f32.mrf.mxu3  ;;  %v1352_v29 = vpop.f32.mrf.mxu2 }
0x11b1   :  { %v1385_v59 = vadd.f32 %v2688_v41, %v1352_v29 }
0x11b2   :  { %2055 = vmatmul.msk.f32.gmra.mxu0 %vm134_vm1, %v1685_v28 }
0x11b8   :  { %v1355_v63 = vpop.f32.mrf.mxu2 }
0x11b9   :  { %v1388_v14 = vadd.f32 %v2692_v19, %v1355_v63 }
0x11c0   :  { %v1548_v30 = vpop.f32.mrf.mxu2 }
0x11c1   :  { %v1554_v31 = vadd.f32 %v1548_v30, %v1385_v59 }
0x11ea   :  { %v1551_v36 = vpop.f32.mrf.mxu2 }
0x11eb   :  { %v1555_v37 = vadd.f32 %v1551_v36, %v1388_v14 }
0x1227   :  { %v1714_v5 = vpop.f32.mrf.mxu0 }
0x1228   :  { %v1720_v34 = vadd.f32 %v1714_v5, %v1554_v31  ;;  %v2013_v31 = vld [vmem:[%s2823_s3 + $0x50] sm:$0xff]  ;;  %v2011_v5 = vld [vmem:[%s2823_s3 + $0x40] sm:$0xff] }
0x1229   :  { %1829 = vmatpush.msrb.mxu2 %v2013_v31 }
0x122a   :  { %v1723_v35 = vadd.f32 %v2111_v33, %v1720_v34  ;;  %v1777_v34 = vperm.slane %v2586_v55, 1 }
0x122c   :  { %v1725_v46 = vadd.f32 %v1723_v35, %v2572_v39 }
0x122e   :  { %v1727_v4 = vsel %vm55_vm0, %v1725_v46, 0.0 }
0x122f   :  { %v1717_v38 = vpop.f32.mrf.mxu0  ;;  %1728 = vadd.xlane.f32.xlu0 %v1727_v4 }
0x1230   :  { %v1721_v40 = vadd.f32 %v1717_v38, %v1555_v37  ;;  %v2114_v38 = vld [vmem:[%s2825_s5 + $0x9] ss:$0 sm:$0xff] }
0x1232   :  { %v1724_v41 = vadd.f32 %v2111_v33, %v1721_v40  ;;  %v2012_v33 = vld [vmem:[%s2823_s3 + $0x48] sm:$0xff] }
0x1233   :  { %1830 = vmatpush.msrb.mxu2 %v2012_v33 }
0x1234   :  { %v1726_v42 = vadd.f32 %v1724_v41, %v2578_v3  ;;  %v2010_v3 = vld [vmem:[%s2822_s2 + $0x78] sm:$0xff]  ;;  %s2243_s2 = smov 8  }
0x1235   :  { %1796 = vmatpush.msra.mxu1 %v2010_v3  ;;  %1831 = vmatpush.msrb.mxu2 %v2011_v5 }
0x1236   :  { %v1730_v43 = vsel %vm55_vm0, %v1726_v42, 0.0 }
0x1237   :  { %1731 = vadd.xlane.f32.xlu1 %v1730_v43  ;;  %1797 = vmatpush.msra.mxu1 %v2008_v54 }
0x1239   :  { %1798 = vmatpush.msra.mxu1 %v2006_v56 }
0x123b   :  { %1799 = vmatpush.msra.mxu1 %v2004_v57 }
0x12a2   :  { %v1729_v44 = vpop.xlane.xlu0 %1728 }
0x12a3   :  { %v1733_v45 = vmul.f32 %v1729_v44, %v2477_v9 }
0x12a5   :  { %v1735_v49 = vsub.f32 %v1725_v46, %v1733_v45 }
0x12a7   :  { %v1737_v50 = vmul.f32 %v1735_v49, %v1735_v49 }
0x12a9   :  { %v1739_v19 = vsel %vm55_vm0, %v1737_v50, 0.0 }
0x12aa   :  { %1740 = vadd.xlane.f32.xlu2 %v1739_v19  ;;  %v1732_v39 = vpop.xlane.xlu1 %1731 }
0x12ab   :  { %v1734_v51 = vmul.f32 %v1732_v39, %v2477_v9 }
0x12ad   :  { %v1736_v17 = vsub.f32 %v1726_v42, %v1734_v51 }
0x12af   :  { %v1738_v52 = vmul.f32 %v1736_v17, %v1736_v17 }
0x12b1   :  { %v1742_v53 = vsel %vm55_vm0, %v1738_v52, 0.0 }
0x12b2   :  { %1743 = vadd.xlane.f32.xlu0 %v1742_v53 }
0x131d   :  { %v1741_v8 = vpop.xlane.xlu2 %1740 }
0x131e   :  { %v1745_v58 = vmul.f32 %v1741_v8, %v2477_v9 }
0x1320   :  { %v1747_v60 = vadd.f32 1e-05, %v1745_v58 }
0x1322   :  { %2193 = vrsqrt.f32 %v1747_v60  ;;  %vm1755_vm2 = vweird.f32 %v1747_v60 }
0x1325   :  { %v1744_v6 = vpop.xlane.xlu0 %1743 }
0x1326   :  { %v1746_v26 = vmul.f32 %v1744_v6, %v2477_v9 }
0x1328   :  { %v2194_v11 = vpop.eup %2193  ;;  %v1748_v27 = vadd.f32 1e-05, %v1746_v26 }
0x1329   :  { %v1750_v12 = vmul.f32 %v2194_v11, %v1747_v60  ;;  %vm1756_vm1 = vweird.f32 %v2194_v11 }
0x132a   :  { %2195 = vrsqrt.f32 %v1748_v27  ;;  %vm1757_vm3 = vmor %vm1755_vm2, %vm1756_vm1  ;;  %vm1765_vm5 = vweird.f32 %v1748_v27 }
0x132b   :  { %v1751_v13 = vmul.f32 %v2194_v11, %v1750_v12 }
0x132d   :  { %v1752_v7 = vmul.f32 0.5, %v1751_v13  ;;  %v2115_v13 = vld [vmem:[%s2825_s5 + $0xc] ss:$0 sm:$0xff] }
0x132f   :  { %v1753_v15 = vsub.f32 1.5, %v1752_v7 }
0x1330   :  { %v2196_v16 = vpop.eup %2195 }
0x1331   :  { %v1754_v1 = vmul.f32 %v2194_v11, %v1753_v15  ;;  %v1760_v18 = vmul.f32 %v2196_v16, %v1748_v27  ;;  %vm1766_vm4 = vweird.f32 %v2196_v16 }
0x1332   :  { %vm1767_vm6 = vmor %vm1765_vm5, %vm1766_vm4 }
0x1333   :  { %v1758_v22 = vsel %vm1757_vm3, %v2194_v11, %v1754_v1  ;;  %v1761_v0 = vmul.f32 %v2196_v16, %v1760_v18  ;;  %v2116_v1 = vld [vmem:[%s2825_s5 + $0xd] ss:$0 sm:$0xff] }
0x1334   :  { %v1769_v20 = vmul.f32 %v1758_v22, %v1735_v49 }
0x1335   :  { %v1762_v48 = vmul.f32 0.5, %v1761_v0 }
0x1336   :  { %v1772_v23 = vmul.f32 %v2112_v32, %v1769_v20 }
0x1337   :  { %v1763_v24 = vsub.f32 1.5, %v1762_v48 }
0x1338   :  { %v1775_v25 = vadd.f32 %v2113_v21, %v1772_v23 }
0x1339   :  { %v1764_v28 = vmul.f32 %v2196_v16, %v1763_v24 }
0x133a   :  { %2056 = vmatmul.msk.f32.vlgmr.msra.gmra.mxu1 %vm55_vm0, %v1775_v25 }
0x133b   :  { %v1768_v29 = vsel %vm1767_vm6, %v2196_v16, %v1764_v28 }
0x133c   :  { %v1770_v63 = vmul.f32 %v1768_v29, %v1736_v17 }
0x133e   :  { %v1773_v30 = vmul.f32 %v2112_v32, %v1770_v63 }
0x1340   :  { %v1776_v59 = vadd.f32 %v2113_v21, %v1773_v30 }
0x1342   :  { %2057 = vmatmul.msk.f32.gmra.mxu1 %vm55_vm0, %v1776_v59 }
0x13b7   :  { %v1801_v35 = vpop.f32.mrf.mxu1 }
0x13b8   :  { %v1802_v36 = vadd.f32 %v1801_v35, %v1777_v34 }
0x13ba   :  { %v1807_v14 = vmax.f32 %v1802_v36, 0.0 }
0x13bc   :  { %2058 = vmatmul.msk.f32.vlgmr.msrb.gmra.mxu2 %vm881_vm9, %v1807_v14 }
0x13bf   :  { %v1804_v46 = vpop.f32.mrf.mxu1 }
0x13c0   :  { %v1805_v37 = vadd.f32 %v1804_v46, %v1777_v34 }
0x13c2   :  { %v1808_v4 = vmax.f32 %v1805_v37, 0.0 }
0x13c4   :  { %2059 = vmatmul.msk.f32.gmra.mxu2 %vm881_vm9, %v1808_v4 }
0x143f   :  { %v1833_v40 = vpop.f32.mrf.mxu2 }
0x1440   :  { %v1834_v41 = vadd.f32 %v2114_v38, %v1833_v40 }
0x1442   :  { %v1839_v42 = vadd.f32 %v1834_v41, %v1775_v25 }
0x1444   :  { %v1841_v43 = vsel %vm55_vm0, %v1839_v42, 0.0 }
0x1445   :  { %1842 = vadd.xlane.f32.xlu1 %v1841_v43 }
0x1447   :  { %v1836_v55 = vpop.f32.mrf.mxu2 }
0x1448   :  { %v1837_v44 = vadd.f32 %v2114_v38, %v1836_v55 }
0x144a   :  { %v1840_v45 = vadd.f32 %v1837_v44, %v1776_v59 }
0x144c   :  { %v1844_v49 = vsel %vm55_vm0, %v1840_v45, 0.0 }
0x144d   :  { %1845 = vadd.xlane.f32.xlu2 %v1844_v49 }
0x14b8   :  { %v1843_v50 = vpop.xlane.xlu1 %1842 }
0x14b9   :  { %v1847_v19 = vmul.f32 %v1843_v50, %v2477_v9 }
0x14bb   :  { %v1849_v39 = vsub.f32 %v1839_v42, %v1847_v19  ;;  %v2117_v19 = vld [vmem:[%s2825_s5 + $0xe] ss:$0 sm:$0xff] }
0x14bd   :  { %v1851_v51 = vmul.f32 %v1849_v39, %v1849_v39 }
0x14bf   :  { %v1853_v17 = vsel %vm55_vm0, %v1851_v51, 0.0 }
0x14c0   :  { %v1846_v52 = vpop.xlane.xlu2 %1845  ;;  %1854 = vadd.xlane.f32.xlu0 %v1853_v17  ;;  %v2118_v17 = vld [vmem:[%s2825_s5 + $0xf] ss:$0 sm:$0xff]  ;;  %s2242_s5 = smov 128  }
0x14c1   :  { %v1848_v53 = vmul.f32 %v1846_v52, %v2477_v9 }
0x14c3   :  { %v1850_v3 = vsub.f32 %v1840_v45, %v1848_v53 }
0x14c5   :  { %v1852_v54 = vmul.f32 %v1850_v3, %v1850_v3 }
0x14c7   :  { %v1856_v56 = vsel %vm55_vm0, %v1852_v54, 0.0 }
0x14c8   :  { %1857 = vadd.xlane.f32.xlu1 %v1856_v56 }
0x1533   :  { %v1855_v57 = vpop.xlane.xlu0 %1854 }
0x1534   :  { %v1859_v8 = vmul.f32 %v1855_v57, %v2477_v9 }
0x1536   :  { %v1861_v58 = vadd.f32 1e-05, %v1859_v8 }
0x1538   :  { %2197 = vrsqrt.f32 %v1861_v58  ;;  %vm1869_vm8 = vweird.f32 %v1861_v58 }
0x153b   :  { %v1858_v60 = vpop.xlane.xlu1 %1857 }
0x153c   :  { %v1860_v61 = vmul.f32 %v1858_v60, %v2477_v9 }
0x153e   :  { %v2198_v62 = vpop.eup %2197  ;;  %v1862_v2 = vadd.f32 1e-05, %v1860_v61 }
0x153f   :  { %v1864_v6 = vmul.f32 %v2198_v62, %v1861_v58  ;;  %vm1870_vm7 = vweird.f32 %v2198_v62 }
0x1540   :  { %2199 = vrsqrt.f32 %v1862_v2  ;;  %vm1871_vm9 = vmor %vm1869_vm8, %vm1870_vm7  ;;  %vm1879_vm11 = vweird.f32 %v1862_v2 }
0x1541   :  { %v1865_v26 = vmul.f32 %v2198_v62, %v1864_v6 }
0x1543   :  { %v1866_v47 = vmul.f32 0.5, %v1865_v26 }
0x1545   :  { %v1867_v11 = vsub.f32 1.5, %v1866_v47 }
0x1546   :  { %v2200_v27 = vpop.eup %2199 }
0x1547   :  { %v1868_v10 = vmul.f32 %v2198_v62, %v1867_v11  ;;  %v1874_v12 = vmul.f32 %v2200_v27, %v1862_v2  ;;  %vm1880_vm10 = vweird.f32 %v2200_v27 }
0x1548   :  { %vm1881_vm12 = vmor %vm1879_vm11, %vm1880_vm10 }
0x1549   :  { %v1875_v7 = vmul.f32 %v2200_v27, %v1874_v12  ;;  %v1872_v15 = vsel %vm1871_vm9, %v2198_v62, %v1868_v10 }
0x154a   :  { %v1883_v16 = vmul.f32 %v1872_v15, %v1849_v39 }
0x154b   :  { %v1876_v18 = vmul.f32 0.5, %v1875_v7 }
0x154c   :  { %v1886_v32 = vmul.f32 %v2115_v13, %v1883_v16 }
0x154d   :  { %v1877_v22 = vsub.f32 1.5, %v1876_v18 }
0x154e   :  { %v1889_v0 = vadd.f32 %v2116_v1, %v1886_v32 }
0x154f   :  { %v1878_v20 = vmul.f32 %v2200_v27, %v1877_v22 }
0x1550   :  { %v1893_v21 = vsel %vm55_vm0, %v1889_v0, 0.0 }
0x1551   :  { %1894 = vadd.xlane.f32.xlu2 %v1893_v21  ;;  %v1882_v48 = vsel %vm1881_vm12, %v2200_v27, %v1878_v20 }
0x1552   :  { %v1884_v23 = vmul.f32 %v1882_v48, %v1850_v3 }
0x1554   :  { %v1887_v24 = vmul.f32 %v2115_v13, %v1884_v23 }
0x1556   :  { %v1890_v25 = vadd.f32 %v2116_v1, %v1887_v24 }
0x1558   :  { %v1896_v28 = vsel %vm55_vm0, %v1890_v25, 0.0 }
0x1559   :  { %1897 = vadd.xlane.f32.xlu0 %v1896_v28 }
0x15c4   :  { %v1895_v29 = vpop.xlane.xlu2 %1894 }
0x15c5   :  { %v1899_v63 = vmul.f32 %v1895_v29, %v2477_v9 }
0x15c7   :  { %v1901_v30 = vsub.f32 %v1889_v0, %v1899_v63 }
0x15c9   :  { %v1903_v59 = vmul.f32 %v1901_v30, %v1901_v30 }
0x15cb   :  { %v1905_v31 = vsel %vm55_vm0, %v1903_v59, 0.0 }
0x15cc   :  { %1906 = vadd.xlane.f32.xlu1 %v1905_v31  ;;  %v1898_v33 = vpop.xlane.xlu0 %1897 }
0x15cd   :  { %v1900_v5 = vmul.f32 %v1898_v33, %v2477_v9 }
0x15cf   :  { %v1902_v34 = vsub.f32 %v1890_v25, %v1900_v5 }
0x15d1   :  { %v1904_v35 = vmul.f32 %v1902_v34, %v1902_v34 }
0x15d3   :  { %v1908_v36 = vsel %vm55_vm0, %v1904_v35, 0.0 }
0x15d4   :  { %1909 = vadd.xlane.f32.xlu2 %v1908_v36 }
0x163f   :  { %v1907_v14 = vpop.xlane.xlu1 %1906 }
0x1640   :  { %v1911_v46 = vmul.f32 %v1907_v14, %v2477_v9 }
0x1642   :  { %v1913_v37 = vadd.f32 1e-05, %v1911_v46 }
0x1644   :  { %2201 = vrsqrt.f32 %v1913_v37  ;;  %vm1921_vm14 = vweird.f32 %v1913_v37 }
0x1647   :  { %v1910_v4 = vpop.xlane.xlu2 %1909 }
0x1648   :  { %v1912_v38 = vmul.f32 %v1910_v4, %v2477_v9 }
0x164a   :  { %v2202_v40 = vpop.eup %2201  ;;  %v1914_v41 = vadd.f32 1e-05, %v1912_v38 }
0x164b   :  { %v1916_v42 = vmul.f32 %v2202_v40, %v1913_v37  ;;  %vm1922_vm13 = vweird.f32 %v2202_v40 }
0x164c   :  { %2203 = vrsqrt.f32 %v1914_v41  ;;  %vm1923_vm15 = vmor %vm1921_vm14, %vm1922_vm13  ;;  %vm1931_vm2 = vweird.f32 %v1914_v41 }
0x164d   :  { %v1917_v43 = vmul.f32 %v2202_v40, %v1916_v42 }
0x164f   :  { %v1918_v55 = vmul.f32 0.5, %v1917_v43 }
0x1651   :  { %v1919_v44 = vsub.f32 1.5, %v1918_v55 }
0x1652   :  { %v2204_v45 = vpop.eup %2203 }
0x1653   :  { %v1920_v49 = vmul.f32 %v2202_v40, %v1919_v44  ;;  %v1926_v50 = vmul.f32 %v2204_v45, %v1914_v41  ;;  %vm1932_vm1 = vweird.f32 %v2204_v45 }
0x1654   :  { %vm1933_vm3 = vmor %vm1931_vm2, %vm1932_vm1 }
0x1655   :  { %v1924_v39 = vsel %vm1923_vm15, %v2202_v40, %v1920_v49  ;;  %v1927_v51 = vmul.f32 %v2204_v45, %v1926_v50 }
0x1656   :  { %v1935_v9 = vmul.f32 %v1924_v39, %v1901_v30 }
0x1657   :  { %v1928_v52 = vmul.f32 0.5, %v1927_v51 }
0x1658   :  { %v1938_v53 = vmul.f32 %v2117_v19, %v1935_v9 }
0x1659   :  { %v1929_v3 = vsub.f32 1.5, %v1928_v52 }
0x165a   :  { %v1941_v54 = vadd.f32 %v2118_v17, %v1938_v53 }
0x165b   :  { %v1930_v56 = vmul.f32 %v2204_v45, %v1929_v3 }
0x165c   :  { %1943 = vst.msk [vmem:[#allocation2] sm:$0xff] %vm55_vm0, %v1941_v54 }
0x165d   :  { %v1934_v57 = vsel %vm1933_vm3, %v2204_v45, %v1930_v56 }
0x165e   :  { %v1936_v8 = vmul.f32 %v1934_v57, %v1902_v34 }
0x1660   :  { %v1939_v58 = vmul.f32 %v2117_v19, %v1936_v8 }
0x1662   :  { %v1942_v60 = vadd.f32 %v2118_v17, %v1939_v58 }
0x1664   :  { %1944 = vst.msk [vmem:[#allocation2 + $0x8] sm:$0xff] %vm55_vm0, %v1942_v60 }
0x1665   :  { %1957 = dma.vmem_to_hbm [thread:$0]  %s1950_s18, 256, %s1952_s26, [#allocation3], %s2242_s5, %s2242_s5, %s2243_s2  }
0x1666   :  { %2229 = dma.done.wait [#allocation3], 256  }
0x1667   :  { %2230 = vsyncadd [#allocation3], 4294967040 }
0x1668   :  { %1962 = vsyncpa [#allocation3], 1 }

</bundles_post_ra>
